<compile_context>
chip_gen: v7x
topology: tpu7x:2x2x1
jax: 0.10.0
libtpu: 0.0.40
codegen_flags: <defaults>
</compile_context>

<pallas_src>
import functools

import jax
import jax.numpy as jnp
from jax import lax
from jax.experimental import pallas as pl
from jax.experimental.pallas import tpu as pltpu


def _round_up(x, m):
    return (x + m - 1) // m * m


# ------------------------------ fused kernel ------------------------------- #

def _relu_conv_bn_kernel(a_ref, b_ref, gamma_ref, beta_ref, o_ref,
                         y_scr, sum_scr, ssq_scr, scale_scr, bias_scr,
                         *, m_total, eps, tm):
    """Pass 0: ReLU + im2col matmul + channel stats (into resident VMEM).
       Pass 1: BatchNorm apply (y * scale + bias) with hoisted scale/bias."""
    p = pl.program_id(0)            # 0 = conv+stats, 1 = BN apply
    i = pl.program_id(1)            # row tile
    n_tiles = pl.num_programs(1)

    @pl.when(jnp.logical_and(p == 0, i == 0))
    def _init():
        sum_scr[...] = jnp.zeros_like(sum_scr)
        ssq_scr[...] = jnp.zeros_like(ssq_scr)

    @pl.when(p == 0)
    def _pass0():
        a = jnp.maximum(a_ref[...], jnp.zeros((), a_ref.dtype))            # ReLU
        y = jnp.dot(a, b_ref[...], preferred_element_type=jnp.float32)     # MXU
        row = pl.multiple_of(i * tm, tm)
        y_scr[pl.ds(row, tm), :] = y                                        # keep y in VMEM
        sum_scr[...] += jnp.sum(y, axis=0, keepdims=True)
        ssq_scr[...] += jnp.sum(y * y, axis=0, keepdims=True)

    @pl.when(jnp.logical_and(p == 0, i == n_tiles - 1))
    def _finalize_stats():
        # Hoisted BN prologue: computed exactly once per call.
        inv_m = 1.0 / m_total
        mean = sum_scr[...] * inv_m
        var = ssq_scr[...] * inv_m - mean * mean     # biased (training-mode) variance
        scale = gamma_ref[...] * lax.rsqrt(var + eps)
        scale_scr[...] = scale
        bias_scr[...] = beta_ref[...] - mean * scale

    @pl.when(p == 1)
    def _pass1():
        row = pl.multiple_of(i * tm, tm)
        o_ref[...] = y_scr[pl.ds(row, tm), :] * scale_scr[...] + bias_scr[...]


# ------------------------------ host wrapper ------------------------------- #

def relu_conv_bn(x_nchw, weight, gamma, beta, *, stride=1, padding=1,
                 dilation=1, eps=1e-5, matmul_dtype=jnp.bfloat16):
    N, C_in, H, W = x_nchw.shape
    C_out, _, kh, kw = weight.shape

    # NCHW -> NHWC (channels on the lane axis), spatial zero padding.
    x = jnp.transpose(x_nchw, (0, 2, 3, 1)).astype(jnp.float32)
    xp = jnp.pad(x, ((0, 0), (padding, padding), (padding, padding), (0, 0)))

    H_out = (H + 2 * padding - dilation * (kh - 1) - 1) // stride + 1
    W_out = (W + 2 * padding - dilation * (kw - 1) - 1) // stride + 1

    # im2col patch matrix (glue; ReLU is applied inside the kernel — padded
    # zeros stay zero under ReLU so it commutes with patch extraction).
    # TODO(synk): replace with tap-wise accumulating matmuls over shifted NHWC
    # views to avoid materializing the kh*kw-times-larger A in HBM.
    patches = []
    for i in range(kh):
        for j in range(kw):
            hs, ws = i * dilation, j * dilation
            p = xp[:, hs:hs + stride * (H_out - 1) + 1:stride,
                      ws:ws + stride * (W_out - 1) + 1:stride, :]
            patches.append(p)                                   # (N, H_out, W_out, C_in)
    M = N * H_out * W_out
    K = kh * kw * C_in
    A = jnp.stack(patches, axis=3).reshape(M, K)

    # Conv weight (C_out, C_in, kh, kw) -> (kh*kw*C_in, C_out), matching A's K order.
    B = jnp.transpose(weight, (2, 3, 1, 0)).reshape(K, C_out).astype(jnp.float32)

    # ---- tiling: lane-dense channels, big sublane-aligned row tiles ----
    C_pad = _round_up(C_out, 128)                 # unmasked full-lane stores
    tm = min(512, _round_up(M, 8))                # >= 8 sublanes, up to 512 rows
    M_pad = _round_up(M, tm)                      # pad M instead of shrinking tm
    n_tiles = M_pad // tm

    # Zero-padded rows/channels contribute 0 to sum/ssq; divide by the real M.
    A = jnp.pad(A, ((0, M_pad - M), (0, 0))).astype(matmul_dtype)
    Bp = jnp.pad(B, ((0, 0), (0, C_pad - C_out))).astype(matmul_dtype)
    gamma2 = jnp.pad(gamma.reshape(1, C_out).astype(jnp.float32),
                     ((0, 0), (0, C_pad - C_out)))
    beta2 = jnp.pad(beta.reshape(1, C_out).astype(jnp.float32),
                    ((0, 0), (0, C_pad - C_out)))

    itemsize = jnp.dtype(matmul_dtype).itemsize
    vmem_need = (M_pad * C_pad * 4                 # resident y scratch
                 + 2 * tm * K * itemsize           # double-buffered A tiles
                 + 2 * K * C_pad * itemsize        # B (resident, counted x2)
                 + 2 * tm * C_pad * 4              # double-buffered out tiles
                 + 12 * C_pad * 4)                 # small per-channel scratch
    if vmem_need > 40 * 1024 * 1024:
        # TODO(synk): fall back to a two-pass (stats kernel + BN kernel) pipeline
        # with y staged through HBM when the resident y scratch exceeds VMEM.
        raise NotImplementedError("conv output too large for resident-VMEM fusion")
    vmem_limit = int(min(max(vmem_need + (4 << 20), 16 << 20), 48 << 20))

    kernel = functools.partial(_relu_conv_bn_kernel,
                               m_total=float(M), eps=float(eps), tm=tm)

    out = pl.pallas_call(
        kernel,
        out_shape=jax.ShapeDtypeStruct((M_pad, C_pad), jnp.float32),
        grid_spec=pltpu.PrefetchScalarGridSpec(
            num_scalar_prefetch=0,
            grid=(2, n_tiles),
            in_specs=[
                # pass 0 streams A tiles; pass 1 pins tile 0 (no useless refetch).
                pl.BlockSpec((tm, K), lambda p, i: (i * (1 - p), 0)),
                pl.BlockSpec((K, C_pad), lambda p, i: (0, 0)),
                pl.BlockSpec((1, C_pad), lambda p, i: (0, 0)),
                pl.BlockSpec((1, C_pad), lambda p, i: (0, 0)),
            ],
            # output stays resident during pass 0; written + streamed in pass 1.
            out_specs=pl.BlockSpec((tm, C_pad), lambda p, i: (i * p, 0)),
            scratch_shapes=[
                pltpu.VMEM((M_pad, C_pad), jnp.float32),   # resident conv output
                pltpu.VMEM((1, C_pad), jnp.float32),       # channel sum
                pltpu.VMEM((1, C_pad), jnp.float32),       # channel sum of squares
                pltpu.VMEM((1, C_pad), jnp.float32),       # BN scale
                pltpu.VMEM((1, C_pad), jnp.float32),       # BN bias
            ],
        ),
        compiler_params=pltpu.CompilerParams(
            dimension_semantics=("arbitrary", "arbitrary"),
            vmem_limit_bytes=vmem_limit),
    )(A, Bp, gamma2, beta2)

    out = out[:M, :C_out].reshape(N, H_out, W_out, C_out)
    return jnp.transpose(out, (0, 3, 1, 2))


# -------------------------------- reference -------------------------------- #

def relu_conv_bn_reference(x_nchw, weight, gamma, beta, *, stride=1, padding=1,
                           dilation=1, eps=1e-5):
    xr = jnp.maximum(x_nchw, 0.0)
    y = lax.conv_general_dilated(
        xr, weight,
        window_strides=(stride, stride),
        padding=((padding, padding), (padding, padding)),
        rhs_dilation=(dilation, dilation),
        dimension_numbers=("NCHW", "OIHW", "NCHW"))
    mean = jnp.mean(y, axis=(0, 2, 3), keepdims=True)
    var = jnp.mean((y - mean) ** 2, axis=(0, 2, 3), keepdims=True)  # biased var
    yhat = (y - mean) / jnp.sqrt(var + eps)
    return yhat * gamma.reshape(1, -1, 1, 1) + beta.reshape(1, -1, 1, 1)


# ---------------------------------- main ------------------------------------ #

if __name__ == "__main__":
    # ReLUConvBN(C_in=4, C_out=8, kernel_size=3, stride=1, padding=1,
    #            dilation=1, affine=True)
    N, C_in, H, W = 2, 4, 16, 16
    C_out, kh, kw = 8, 3, 3
    stride, padding, dilation = 1, 1, 1

    key = jax.random.PRNGKey(0)
    kx, kw_, kg, kb = jax.random.split(key, 4)

    x = jax.random.normal(kx, (N, C_in, H, W), dtype=jnp.float32)
    weight = jax.random.normal(kw_, (C_out, C_in, kh, kw), dtype=jnp.float32) * 0.1
    gamma = 1.0 + 0.1 * jax.random.normal(kg, (C_out,), dtype=jnp.float32)
    beta = 0.1 * jax.random.normal(kb, (C_out,), dtype=jnp.float32)

    ref = jax.block_until_ready(
        relu_conv_bn_reference(x, weight, gamma, beta,
                               stride=stride, padding=padding, dilation=dilation))

    # f32-MXU path: tight check of kernel logic.
    out_f32 = jax.block_until_ready(
        relu_conv_bn(x, weight, gamma, beta, stride=stride, padding=padding,
                     dilation=dilation, matmul_dtype=jnp.float32))
    assert out_f32.shape == (N, C_out, H, W), out_f32.shape
    assert jnp.allclose(out_f32, ref, atol=1e-4, rtol=1e-4), \
        float(jnp.max(jnp.abs(out_f32 - ref)))

    # bf16-MXU path (perf default on v6e/v7x): tolerance reflects bf16 inputs
    # to the matmul; stats/BN math stays f32.
    out_bf16 = jax.block_until_ready(
        relu_conv_bn(x, weight, gamma, beta, stride=stride, padding=padding,
                     dilation=dilation, matmul_dtype=jnp.bfloat16))
    assert out_bf16.shape == (N, C_out, H, W), out_bf16.shape
    assert jnp.allclose(out_bf16, ref, atol=3e-2, rtol=3e-2), \
        float(jnp.max(jnp.abs(out_bf16 - ref)))

    print("KERNEL_OK")
</pallas_src>

<mosaic_0001>
module attributes {stable_mosaic.version = 11 : i64} {
  func.func @_relu_conv_bn_kernel(%arg0: i32, %arg1: i32, %arg2: memref<512x36xf32, #tpu.memory_space<vmem>>, %arg3: memref<36x128xf32, #tpu.memory_space<vmem>>, %arg4: memref<1x128xf32, #tpu.memory_space<vmem>>, %arg5: memref<1x128xf32, #tpu.memory_space<vmem>>, %arg6: memref<512x128xf32, #tpu.memory_space<vmem>>, %arg7: memref<512x128xf32, #tpu.memory_space<vmem>>, %arg8: memref<1x128xf32, #tpu.memory_space<vmem>>, %arg9: memref<1x128xf32, #tpu.memory_space<vmem>>, %arg10: memref<1x128xf32, #tpu.memory_space<vmem>>, %arg11: memref<1x128xf32, #tpu.memory_space<vmem>>) attributes {dimension_semantics = [#tpu.dimension_semantics<arbitrary>, #tpu.dimension_semantics<arbitrary>], iteration_bounds = array<i64: 2, 1>, scalar_prefetch = 0 : i64, scratch_operands = 5 : i64, tpu.core_type = #tpu.core_type<tc>, window_params = [{transform_indices = @transform_0, window_bounds = array<i64: 512, 36>}, {pipeline_mode = #tpu.pipeline_mode<synchronous>, transform_indices = @transform_1, window_bounds = array<i64: 36, 128>}, {pipeline_mode = #tpu.pipeline_mode<synchronous>, transform_indices = @transform_2, window_bounds = array<i64: 1, 128>}, {pipeline_mode = #tpu.pipeline_mode<synchronous>, transform_indices = @transform_3, window_bounds = array<i64: 1, 128>}, {transform_indices = @transform_4, window_bounds = array<i64: 512, 128>}]} {
    %c0_i32 = arith.constant 0 : i32
    %0 = arith.cmpi eq, %arg0, %c0_i32 : i32
    %c0_i32_0 = arith.constant 0 : i32
    %1 = arith.cmpi eq, %arg1, %c0_i32_0 : i32
    %2 = arith.andi %0, %1 : i1
    %3 = arith.extui %2 : i1 to i32
    %c0_i32_1 = arith.constant 0 : i32
    %4 = arith.cmpi ne, %3, %c0_i32_1 : i32
    scf.if %4 {
      %cst = arith.constant 0.000000e+00 : f32
      %16 = vector.broadcast %cst : f32 to vector<1x128xf32>
      %c0 = arith.constant 0 : index
      %c0_8 = arith.constant 0 : index
      %17 = vector.load %arg8[%c0, %c0_8] : memref<1x128xf32, #tpu.memory_space<vmem>>, vector<1x128xf32>
      tpu.vector_store %arg8[%c0, %c0_8], %16 {strides = array<i32>} : memref<1x128xf32, #tpu.memory_space<vmem>>, vector<1x128xf32>,
      %cst_9 = arith.constant 0.000000e+00 : f32
      %18 = vector.broadcast %cst_9 : f32 to vector<1x128xf32>
      %c0_10 = arith.constant 0 : index
      %c0_11 = arith.constant 0 : index
      %19 = vector.load %arg9[%c0_10, %c0_11] : memref<1x128xf32, #tpu.memory_space<vmem>>, vector<1x128xf32>
      tpu.vector_store %arg9[%c0_10, %c0_11], %18 {strides = array<i32>} : memref<1x128xf32, #tpu.memory_space<vmem>>, vector<1x128xf32>,
    } else {
    }
    %c0_i32_2 = arith.constant 0 : i32
    %5 = arith.cmpi eq, %arg0, %c0_i32_2 : i32
    %6 = arith.extui %5 : i1 to i32
    %c0_i32_3 = arith.constant 0 : i32
    %7 = arith.cmpi ne, %6, %c0_i32_3 : i32
    scf.if %7 {
      %c0 = arith.constant 0 : index
      %c0_8 = arith.constant 0 : index
      %16 = vector.load %arg2[%c0, %c0_8] : memref<512x36xf32, #tpu.memory_space<vmem>>, vector<512x36xf32>
      %cst = arith.constant 0.000000e+00 : f32
      %17 = vector.broadcast %cst : f32 to vector<512x36xf32>
      %18 = arith.maximumf %16, %17 : vector<512x36xf32>
      %c0_9 = arith.constant 0 : index
      %c0_10 = arith.constant 0 : index
      %19 = vector.load %arg3[%c0_9, %c0_10] : memref<36x128xf32, #tpu.memory_space<vmem>>, vector<36x128xf32>
      %cst_11 = arith.constant dense<0.000000e+00> : vector<512x128xf32>
      %20 = tpu.matmul %18, %19, %cst_11 {dimension_numbers = #tpu.dot_dimension_numbers<[1], [0], [0], [1], [0, 0, 1, 1], [], []>} : vector<512x36xf32>, vector<36x128xf32>, vector<512x128xf32> -> vector<512x128xf32>
      %c512_i32 = arith.constant 512 : i32
      %21 = arith.muli %arg1, %c512_i32 : i32
      %22 = tpu.assume_multiple %21, 512 : i32
      %23 = arith.index_cast %22 : i32 to index
      %c0_12 = arith.constant 0 : index
      %24 = vector.load %arg7[%23, %c0_12] : memref<512x128xf32, #tpu.memory_space<vmem>>, vector<512x128xf32>
      tpu.vector_store %arg7[%23, %c0_12], %20 {strides = array<i32>} : memref<512x128xf32, #tpu.memory_space<vmem>>, vector<512x128xf32>,
      %c0_13 = arith.constant 0 : index
      %c0_14 = arith.constant 0 : index
      %25 = vector.load %arg8[%c0_13, %c0_14] : memref<1x128xf32, #tpu.memory_space<vmem>>, vector<1x128xf32>
      %cst_15 = arith.constant dense<0.000000e+00> : vector<128xf32>
      %26 = vector.multi_reduction <add>, %20, %cst_15 [0] : vector<512x128xf32> to vector<128xf32>
      %27 = vector.shape_cast %26 : vector<128xf32> to vector<1x128xf32>
      %28 = arith.addf %25, %27 : vector<1x128xf32>
      %c0_16 = arith.constant 0 : index
      %c0_17 = arith.constant 0 : index
      %29 = vector.load %arg8[%c0_16, %c0_17] : memref<1x128xf32, #tpu.memory_space<vmem>>, vector<1x128xf32>
      tpu.vector_store %arg8[%c0_16, %c0_17], %28 {strides = array<i32>} : memref<1x128xf32, #tpu.memory_space<vmem>>, vector<1x128xf32>,
      %c0_18 = arith.constant 0 : index
      %c0_19 = arith.constant 0 : index
      %30 = vector.load %arg9[%c0_18, %c0_19] : memref<1x128xf32, #tpu.memory_space<vmem>>, vector<1x128xf32>
      %31 = arith.mulf %20, %20 : vector<512x128xf32>
      %cst_20 = arith.constant dense<0.000000e+00> : vector<128xf32>
      %32 = vector.multi_reduction <add>, %31, %cst_20 [0] : vector<512x128xf32> to vector<128xf32>
      %33 = vector.shape_cast %32 : vector<128xf32> to vector<1x128xf32>
      %34 = arith.addf %30, %33 : vector<1x128xf32>
      %c0_21 = arith.constant 0 : index
      %c0_22 = arith.constant 0 : index
      %35 = vector.load %arg9[%c0_21, %c0_22] : memref<1x128xf32, #tpu.memory_space<vmem>>, vector<1x128xf32>
      tpu.vector_store %arg9[%c0_21, %c0_22], %34 {strides = array<i32>} : memref<1x128xf32, #tpu.memory_space<vmem>>, vector<1x128xf32>,
    } else {
    }
    %c0_i32_4 = arith.constant 0 : i32
    %8 = arith.cmpi eq, %arg0, %c0_i32_4 : i32
    %c0_i32_5 = arith.constant 0 : i32
    %9 = arith.cmpi eq, %arg1, %c0_i32_5 : i32
    %10 = arith.andi %8, %9 : i1
    %11 = arith.extui %10 : i1 to i32
    %c0_i32_6 = arith.constant 0 : i32
    %12 = arith.cmpi ne, %11, %c0_i32_6 : i32
    scf.if %12 {
      %c0 = arith.constant 0 : index
      %c0_8 = arith.constant 0 : index
      %16 = vector.load %arg8[%c0, %c0_8] : memref<1x128xf32, #tpu.memory_space<vmem>>, vector<1x128xf32>
      %cst = arith.constant 0.001953125 : f32
      %17 = vector.broadcast %cst : f32 to vector<1x128xf32>
      %18 = arith.mulf %16, %17 : vector<1x128xf32>
      %c0_9 = arith.constant 0 : index
      %c0_10 = arith.constant 0 : index
      %19 = vector.load %arg9[%c0_9, %c0_10] : memref<1x128xf32, #tpu.memory_space<vmem>>, vector<1x128xf32>
      %cst_11 = arith.constant 0.001953125 : f32
      %20 = vector.broadcast %cst_11 : f32 to vector<1x128xf32>
      %21 = arith.mulf %19, %20 : vector<1x128xf32>
      %22 = arith.mulf %18, %18 : vector<1x128xf32>
      %23 = arith.subf %21, %22 : vector<1x128xf32>
      %c0_12 = arith.constant 0 : index
      %c0_13 = arith.constant 0 : index
      %24 = vector.load %arg4[%c0_12, %c0_13] : memref<1x128xf32, #tpu.memory_space<vmem>>, vector<1x128xf32>
      %cst_14 = arith.constant 9.99999974E-6 : f32
      %25 = vector.broadcast %cst_14 : f32 to vector<1x128xf32>
      %26 = arith.addf %23, %25 : vector<1x128xf32>
      %27 = math.rsqrt %26 : vector<1x128xf32>
      %28 = arith.mulf %24, %27 : vector<1x128xf32>
      %c0_15 = arith.constant 0 : index
      %c0_16 = arith.constant 0 : index
      %29 = vector.load %arg10[%c0_15, %c0_16] : memref<1x128xf32, #tpu.memory_space<vmem>>, vector<1x128xf32>
      tpu.vector_store %arg10[%c0_15, %c0_16], %28 {strides = array<i32>} : memref<1x128xf32, #tpu.memory_space<vmem>>, vector<1x128xf32>,
      %c0_17 = arith.constant 0 : index
      %c0_18 = arith.constant 0 : index
      %30 = vector.load %arg5[%c0_17, %c0_18] : memref<1x128xf32, #tpu.memory_space<vmem>>, vector<1x128xf32>
      %31 = arith.mulf %18, %28 : vector<1x128xf32>
      %32 = arith.subf %30, %31 : vector<1x128xf32>
      %c0_19 = arith.constant 0 : index
      %c0_20 = arith.constant 0 : index
      %33 = vector.load %arg11[%c0_19, %c0_20] : memref<1x128xf32, #tpu.memory_space<vmem>>, vector<1x128xf32>
      tpu.vector_store %arg11[%c0_19, %c0_20], %32 {strides = array<i32>} : memref<1x128xf32, #tpu.memory_space<vmem>>, vector<1x128xf32>,
    } else {
    }
    %c1_i32 = arith.constant 1 : i32
    %13 = arith.cmpi eq, %arg0, %c1_i32 : i32
    %14 = arith.extui %13 : i1 to i32
    %c0_i32_7 = arith.constant 0 : i32
    %15 = arith.cmpi ne, %14, %c0_i32_7 : i32
    scf.if %15 {
      %c512_i32 = arith.constant 512 : i32
      %16 = arith.muli %arg1, %c512_i32 : i32
      %17 = tpu.assume_multiple %16, 512 : i32
      %18 = arith.index_cast %17 : i32 to index
      %c0 = arith.constant 0 : index
      %19 = vector.load %arg7[%18, %c0] : memref<512x128xf32, #tpu.memory_space<vmem>>, vector<512x128xf32>
      %c0_8 = arith.constant 0 : index
      %c0_9 = arith.constant 0 : index
      %20 = vector.load %arg10[%c0_8, %c0_9] : memref<1x128xf32, #tpu.memory_space<vmem>>, vector<1x128xf32>
      %21 = vector.broadcast %20 : vector<1x128xf32> to vector<512x128xf32>
      %22 = arith.mulf %19, %21 : vector<512x128xf32>
      %c0_10 = arith.constant 0 : index
      %c0_11 = arith.constant 0 : index
      %23 = vector.load %arg11[%c0_10, %c0_11] : memref<1x128xf32, #tpu.memory_space<vmem>>, vector<1x128xf32>
      %24 = vector.broadcast %23 : vector<1x128xf32> to vector<512x128xf32>
      %25 = arith.addf %22, %24 : vector<512x128xf32>
      %c0_12 = arith.constant 0 : index
      %c0_13 = arith.constant 0 : index
      %26 = vector.load %arg6[%c0_12, %c0_13] : memref<512x128xf32, #tpu.memory_space<vmem>>, vector<512x128xf32>
      tpu.vector_store %arg6[%c0_12, %c0_13], %25 {strides = array<i32>} : memref<512x128xf32, #tpu.memory_space<vmem>>, vector<512x128xf32>,
    } else {
    }
    return
  }
  func.func @transform_0(%arg0: i32, %arg1: i32) -> (i32, i32) {
    %c1_i32 = arith.constant 1 : i32
    %0 = arith.subi %c1_i32, %arg0 : i32
    %1 = arith.muli %arg1, %0 : i32
    %c0_i32 = arith.constant 0 : i32
    %c0_i32_0 = arith.constant 0 : i32
    return %1, %c0_i32 : i32, i32
  }
  func.func @transform_1(%arg0: i32, %arg1: i32) -> (i32, i32) {
    %c0_i32 = arith.constant 0 : i32
    %c0_i32_0 = arith.constant 0 : i32
    %c0_i32_1 = arith.constant 0 : i32
    return %c0_i32, %c0_i32_0 : i32, i32
  }
  func.func @transform_2(%arg0: i32, %arg1: i32) -> (i32, i32) {
    %c0_i32 = arith.constant 0 : i32
    %c0_i32_0 = arith.constant 0 : i32
    %c0_i32_1 = arith.constant 0 : i32
    return %c0_i32, %c0_i32_0 : i32, i32
  }
  func.func @transform_3(%arg0: i32, %arg1: i32) -> (i32, i32) {
    %c0_i32 = arith.constant 0 : i32
    %c0_i32_0 = arith.constant 0 : i32
    %c0_i32_1 = arith.constant 0 : i32
    return %c0_i32, %c0_i32_0 : i32, i32
  }
  func.func @transform_4(%arg0: i32, %arg1: i32) -> (i32, i32) {
    %0 = arith.muli %arg1, %arg0 : i32
    %c0_i32 = arith.constant 0 : i32
    %c0_i32_0 = arith.constant 0 : i32
    return %0, %c0_i32 : i32, i32
  }
}

</mosaic_0001>

<bundles_post_ra>
// kernel: tpu_custom_call.1
= control target key start
LH: loop header
LB: loop body
LE: loop exit
PB: predicated region body
PF: predicated region fallthrough
CT: control target
= control target key end

     0   :  { %9 = vsyncpa [#allocation8], 0  ;;  %s2674_s0 = inlined_call_operand.vmem [shape: f32[512,36], index: 0, kind: input, shape index: {}]   ;;  %s2675_s1 = inlined_call_operand.vmem [shape: f32[36,128], index: 1, kind: input, shape index: {}]   ;;  %s2676_s2 = inlined_call_operand.vmem [shape: f32[1,128], index: 2, kind: input, shape index: {}]   ;;  %s2677_s3 = inlined_call_operand.vmem [shape: f32[1,128], index: 3, kind: input, shape index: {}]   ;;  %s2678_s4 = inlined_call_operand.hbm [shape: f32[512,128], index: 4, kind: output, shape index: {}]  }
   0x1   :  { %11 = vsyncpa [#allocation8 + $0x1], 0  ;;  %s2004_s15 = smov 0   ;;  %s2006_s16 = smov 0  }
   0x2   :  { %s2008_s17 = smov 0  }
   0x3 LB: > { %s1610_s18 = sadd.s32 4294967295, %s1973_s17   ;;  %s1611_s19 = sadd.s32 4294967294, %s1973_s17   ;;  %s1973_s17 = sphi %s2008_s17, %s17_s17   ;;  %s1969_s16 = sphi %s2006_s16, %s2681_s16   ;;  %s1965_s15 = sphi %s2004_s15, %s2680_s15  }
   0x4   : > { %s29_s20 = sadd.s32 1, %s1969_s16  ;;  %p1615_p0 = scmp.ge.s32.totalorder %s1973_s17, 1 }
   0x5   : > { %p31_p1 = scmp.ge.s32.totalorder %s29_s20, 2  ;;  %p188_p2 = scmp.lt.s32.totalorder %s1973_s17, 3 }
   0x7   : > { %s2683_s20 = smov (%p31_p1, %s29_s20), 0  ;;  %p189_p3 = pnand %p1615_p0, %p188_p2 }
   0x8   : > { %p228_p4 = scmp.eq.s32.totalorder (!%p189_p3), %s1965_s15, 0 }
   0x9   : > { %192 = sbr.rel (%p189_p3) target bundleno = 495 (0x1ef), region = 36 }
  0x10   : > { %233 = sbr.rel (!%p228_p4) target bundleno = 23 (0x17), region = 40  ;;  %v1975_v0 = vmov (%p228_p4), 0.0  }
  0x11   : > { %234 = vst [vmem:[#allocation3] sm:$0x1] (%p228_p4), %v1975_v0  ;;  %235 = vst [vmem:[#allocation4] sm:$0x1] (%p228_p4), %v1975_v0 }
  0x17 PF: > { %p1617_p5 = scmp.ne.s32.totalorder %s1965_s15, 0 }
  0x18   : > { %v367_v1 = vld [vmem:[%s2675_s1] sm:$0xff] (!%p1617_p5)  ;;  %v368_v2 = vld [vmem:[%s2675_s1 + $0x8] sm:$0xff] (!%p1617_p5)  ;;  %v369_v3 = vld [vmem:[%s2675_s1 + $0x10] sm:$0xff] (!%p1617_p5)  ;;  %vm372_vm0 = vcmask (!%p1617_p5), 293888   ;;  %vm565_vm1 = vcmask (!%p1617_p5), 1043456  }
  0x19   : > { %238 = sbr.rel (%p1617_p5) target bundleno = 395 (0x18b), region = 44  ;;  %v1866_v4 = vpack.c.bf16 (!%p1617_p5), %v368_v2, %v367_v1  ;;  %v370_v5 = vld [vmem:[%s2675_s1 + $0x18] sm:$0xff] (!%p1617_p5)  ;;  %v239_v6 = vld [vmem:[%s2674_s0] sm:$0xff] (!%p1617_p5)  ;;  %v240_v10 = vld [vmem:[%s2674_s0 + $0x8] sm:$0xff] (!%p1617_p5) }
  0x1a   : > { %v1870_v7 = vpack.c.bf16 (!%p1617_p5), %v370_v5, %v369_v3  ;;  %v303_v8 = vmax.f32 (!%p1617_p5), %v239_v6, 0.0  ;;  %v371_v9 = vld [vmem:[%s2675_s1 + $0x20] sm:$0xf] (!%p1617_p5)  ;;  %v241_v11 = vld [vmem:[%s2674_s0 + $0x10] sm:$0xff] (!%p1617_p5)  ;;  %v304_v12 = vmax.f32 (!%p1617_p5), %v240_v10, 0.0  ;;  %v242_v14 = vld [vmem:[%s2674_s0 + $0x18] sm:$0xff] (!%p1617_p5) }
  0x1b   : > { %1867 = vmatprep.subr.bf16.mxu0 (!%p1617_p5), %v1866_v4  ;;  %1874 = vmatprep.subr.bf16.mxu1 (!%p1617_p5), %v1866_v4  ;;  %v305_v13 = vmax.f32 (!%p1617_p5), %v241_v11, 0.0  ;;  %v243_v15 = vld [vmem:[%s2674_s0 + $0x20] sm:$0xff] (!%p1617_p5)  ;;  %v272_v17 = vld [vmem:[%s2674_s0 + $0x108] sm:$0xff] (!%p1617_p5)  ;;  %v306_v18 = vmax.f32 (!%p1617_p5), %v242_v14, 0.0  ;;  %v273_v21 = vld [vmem:[%s2674_s0 + $0x110] sm:$0xff] (!%p1617_p5) }
  0x1c   : > { %1869 = vmatpush3.bf16.msra.mxu0 (!%p1617_p5), %v1866_v4  ;;  %1770 = vmatprep.mubr.msk.f32.mxu0 (!%p1617_p5), %vm372_vm0, %v303_v8  ;;  %v271_v16 = vld [vmem:[%s2674_s0 + $0x100] sm:$0xff] (!%p1617_p5)  ;;  %v336_v20 = vmax.f32 (!%p1617_p5), %v272_v17, 0.0  ;;  %v274_v22 = vld [vmem:[%s2674_s0 + $0x118] sm:$0xff] (!%p1617_p5)  ;;  %v307_v23 = vmax.f32 (!%p1617_p5), %v243_v15, 0.0  ;;  %v244_v24 = vld [vmem:[%s2674_s0 + $0x28] sm:$0xff] (!%p1617_p5)  ;;  %v337_v25 = vmax.f32 (!%p1617_p5), %v273_v21, 0.0 }
  0x1d   : > { %1871 = vmatprep.subr.bf16.mxu0 (!%p1617_p5), %v1870_v7  ;;  %1877 = vmatpush3.bf16.msra.mxu1 (!%p1617_p5), %v1866_v4  ;;  %v335_v19 = vmax.f32 (!%p1617_p5), %v271_v16, 0.0  ;;  %v275_v26 = vld [vmem:[%s2674_s0 + $0x120] sm:$0xff] (!%p1617_p5)  ;;  %v245_v27 = vld [vmem:[%s2674_s0 + $0x30] sm:$0xff] (!%p1617_p5)  ;;  %v338_v28 = vmax.f32 (!%p1617_p5), %v274_v22, 0.0  ;;  %v308_v29 = vmax.f32 (!%p1617_p5), %v244_v24, 0.0  ;;  %v276_v31 = vld [vmem:[%s2674_s0 + $0x128] sm:$0xff] (!%p1617_p5) }
  0x1e   : > { %1875 = vmatprep.subr.bf16.mxu1 (!%p1617_p5), %v1870_v7  ;;  %v339_v30 = vmax.f32 (!%p1617_p5), %v275_v26, 0.0  ;;  %v309_v32 = vmax.f32 (!%p1617_p5), %v245_v27, 0.0  ;;  %v246_v33 = vld [vmem:[%s2674_s0 + $0x38] sm:$0xff] (!%p1617_p5)  ;;  %v277_v34 = vld [vmem:[%s2674_s0 + $0x130] sm:$0xff] (!%p1617_p5)  ;;  %v247_v35 = vld [vmem:[%s2674_s0 + $0x40] sm:$0xff] (!%p1617_p5)  ;;  %v340_v36 = vmax.f32 (!%p1617_p5), %v276_v31, 0.0 }
  0x1f   : > { %1818 = vmatprep.mubr.msk.f32.mxu1 (!%p1617_p5), %vm372_vm0, %v335_v19  ;;  %v310_v37 = vmax.f32 (!%p1617_p5), %v246_v33, 0.0  ;;  %v341_v38 = vmax.f32 (!%p1617_p5), %v277_v34, 0.0  ;;  %v278_v39 = vld [vmem:[%s2674_s0 + $0x138] sm:$0xff] (!%p1617_p5)  ;;  %v311_v40 = vmax.f32 (!%p1617_p5), %v247_v35, 0.0  ;;  %v248_v41 = vld [vmem:[%s2674_s0 + $0x48] sm:$0xff] (!%p1617_p5)  ;;  %v279_v42 = vld [vmem:[%s2674_s0 + $0x140] sm:$0xff] (!%p1617_p5) }
  0x20   : > { %1873 = vmatpush3.bf16.msra.mxu0 %v1870_v7  ;;  %v249_v43 = vld [vmem:[%s2674_s0 + $0x50] sm:$0xff]  ;;  %v342_v44 = vmax.f32 %v278_v39, 0.0  ;;  %v312_v45 = vmax.f32 %v248_v41, 0.0  ;;  %v343_v46 = vmax.f32 %v279_v42, 0.0  ;;  %v280_v47 = vld [vmem:[%s2674_s0 + $0x148] sm:$0xff]  ;;  %v250_v49 = vld [vmem:[%s2674_s0 + $0x58] sm:$0xff] }
  0x21   : > { %1768 = vmatprep.subr.msk.mxu0 %vm565_vm1, %v371_v9  ;;  %1878 = vmatpush3.bf16.msra.mxu1 %v1870_v7  ;;  %v313_v48 = vmax.f32 %v249_v43, 0.0  ;;  %v281_v50 = vld [vmem:[%s2674_s0 + $0x150] sm:$0xff]  ;;  %v251_v51 = vld [vmem:[%s2674_s0 + $0x60] sm:$0xff]  ;;  %v344_v52 = vmax.f32 %v280_v47, 0.0  ;;  %v314_v53 = vmax.f32 %v250_v49, 0.0  ;;  %v282_v55 = vld [vmem:[%s2674_s0 + $0x158] sm:$0xff] }
  0x22   : > { %1876 = vmatprep.subr.msk.mxu1 %vm565_vm1, %v371_v9  ;;  %v345_v54 = vmax.f32 %v281_v50, 0.0  ;;  %v315_v56 = vmax.f32 %v251_v51, 0.0  ;;  %v252_v57 = vld [vmem:[%s2674_s0 + $0x68] sm:$0xff]  ;;  %v283_v58 = vld [vmem:[%s2674_s0 + $0x160] sm:$0xff]  ;;  %v253_v59 = vld [vmem:[%s2674_s0 + $0x70] sm:$0xff]  ;;  %v346_v60 = vmax.f32 %v282_v55, 0.0 }
  0x23   : > { %v316_v61 = vmax.f32 %v252_v57, 0.0  ;;  %v347_v62 = vmax.f32 %v283_v58, 0.0  ;;  %v284_v63 = vld [vmem:[%s2674_s0 + $0x168] sm:$0xff]  ;;  %v317_v0 = vmax.f32 %v253_v59, 0.0  ;;  %v254_v1 = vld [vmem:[%s2674_s0 + $0x78] sm:$0xff]  ;;  %v285_v2 = vld [vmem:[%s2674_s0 + $0x170] sm:$0xff] }
  0x24   : > { %1769 = vmatpush3.msk.msra.mxu0 %vm565_vm1, %v371_v9  ;;  %v255_v3 = vld [vmem:[%s2674_s0 + $0x80] sm:$0xff]  ;;  %v348_v4 = vmax.f32 %v284_v63, 0.0  ;;  %v318_v5 = vmax.f32 %v254_v1, 0.0  ;;  %v349_v6 = vmax.f32 %v285_v2, 0.0  ;;  %v286_v7 = vld [vmem:[%s2674_s0 + $0x178] sm:$0xff]  ;;  %v257_v11 = vld [vmem:[%s2674_s0 + $0x90] sm:$0xff] }
  0x25   : > { %1771 = vmatmul.mubr.msk.f32.vlgmr.msra.gmra.mrb[0].mxu0 %vm372_vm0, %v304_v12  ;;  %1879 = vmatpush3.msk.msra.mxu1 %vm565_vm1, %v371_v9  ;;  %v319_v8 = vmax.f32 %v255_v3, 0.0  ;;  %v256_v9 = vld [vmem:[%s2674_s0 + $0x88] sm:$0xff]  ;;  %v287_v10 = vld [vmem:[%s2674_s0 + $0x180] sm:$0xff]  ;;  %v350_v12 = vmax.f32 %v286_v7, 0.0  ;;  %v321_v16 = vmax.f32 %v257_v11, 0.0  ;;  %v258_v17 = vld [vmem:[%s2674_s0 + $0x98] sm:$0xff] }
  0x26   : > { %1773 = vmatprep.mubr.msk.f32.mxu0 %vm372_vm0, %v305_v13  ;;  %1819 = vmatmul.mubr.msk.f32.vlgmr.msra.gmra.mrb[0].mxu1 %vm372_vm0, %v336_v20  ;;  %v320_v13 = vmax.f32 %v256_v9, 0.0  ;;  %v351_v14 = vmax.f32 %v287_v10, 0.0  ;;  %v288_v15 = vld [vmem:[%s2674_s0 + $0x188] sm:$0xff]  ;;  %v259_v19 = vld [vmem:[%s2674_s0 + $0xa0] sm:$0xff]  ;;  %v322_v21 = vmax.f32 %v258_v17, 0.0  ;;  %v261_v27 = vld [vmem:[%s2674_s0 + $0xb0] sm:$0xff] }
  0x27   : > { %1821 = vmatprep.mubr.msk.f32.mxu1 %vm372_vm0, %v337_v25  ;;  %v352_v20 = vmax.f32 %v288_v15, 0.0  ;;  %v323_v24 = vmax.f32 %v259_v19, 0.0  ;;  %v260_v25 = vld [vmem:[%s2674_s0 + $0xa8] sm:$0xff]  ;;  %v291_v26 = vld [vmem:[%s2674_s0 + $0x1a0] sm:$0xff]  ;;  %v262_v33 = vld [vmem:[%s2674_s0 + $0xb8] sm:$0xff] }
  0x28   : > { %v292_v31 = vld [vmem:[%s2674_s0 + $0x1a8] sm:$0xff]  ;;  %v293_v34 = vld [vmem:[%s2674_s0 + $0x1b0] sm:$0xff]  ;;  %v263_v35 = vld [vmem:[%s2674_s0 + $0xc0] sm:$0xff] }
  0x29   : > { %1774 = vmatmul.mubr.msk.f32.gmra.mrb[2].mxu0 %vm372_vm0, %v306_v18  ;;  %v289_v18 = vld [vmem:[%s2674_s0 + $0x190] sm:$0xff]  ;;  %v294_v39 = vld [vmem:[%s2674_s0 + $0x1b8] sm:$0xff]  ;;  %v264_v41 = vld [vmem:[%s2674_s0 + $0xc8] sm:$0xff] }
  0x2a   : > { %1776 = vmatprep.mubr.msk.f32.mxu0 %vm372_vm0, %v307_v23  ;;  %1822 = vmatmul.mubr.msk.f32.gmra.mrb[2].mxu1 %vm372_vm0, %v338_v28  ;;  %v353_v22 = vmax.f32 %v289_v18, 0.0  ;;  %v290_v23 = vld [vmem:[%s2674_s0 + $0x198] sm:$0xff]  ;;  %v295_v42 = vld [vmem:[%s2674_s0 + $0x1c0] sm:$0xff]  ;;  %v265_v43 = vld [vmem:[%s2674_s0 + $0xd0] sm:$0xff] }
  0x2b   : > { %1824 = vmatprep.mubr.msk.f32.mxu1 %vm372_vm0, %v339_v30  ;;  %v354_v28 = vmax.f32 %v290_v23, 0.0  ;;  %v355_v30 = vmax.f32 %v291_v26, 0.0  ;;  %v296_v47 = vld [vmem:[%s2674_s0 + $0x1c8] sm:$0xff]  ;;  %v266_v49 = vld [vmem:[%s2674_s0 + $0xd8] sm:$0xff]  ;;  %v297_v50 = vld [vmem:[%s2674_s0 + $0x1d0] sm:$0xff] }
  0x2c   : > { %v267_v51 = vld [vmem:[%s2674_s0 + $0xe0] sm:$0xff]  ;;  %v298_v55 = vld [vmem:[%s2674_s0 + $0x1d8] sm:$0xff]  ;;  %v268_v57 = vld [vmem:[%s2674_s0 + $0xe8] sm:$0xff] }
  0x2d   : > { %1777 = vmatmul.mubr.msk.f32.gmra.mrb[4].mxu0 %vm372_vm0, %v308_v29  ;;  %v324_v29 = vmax.f32 %v260_v25, 0.0  ;;  %v299_v58 = vld [vmem:[%s2674_s0 + $0x1e0] sm:$0xff]  ;;  %v269_v59 = vld [vmem:[%s2674_s0 + $0xf0] sm:$0xff]  ;;  %v300_v63 = vld [vmem:[%s2674_s0 + $0x1e8] sm:$0xff] }
  0x2e   : > { %1779 = vmatprep.mubr.msk.f32.mxu0 %vm372_vm0, %v309_v32  ;;  %1825 = vmatmul.mubr.msk.f32.gmra.mrb[4].mxu1 %vm372_vm0, %v340_v36  ;;  %v325_v32 = vmax.f32 %v261_v27, 0.0  ;;  %v356_v36 = vmax.f32 %v292_v31, 0.0  ;;  %v270_v1 = vld [vmem:[%s2674_s0 + $0xf8] sm:$0xff]  ;;  %v301_v2 = vld [vmem:[%s2674_s0 + $0x1f0] sm:$0xff]  ;;  %v364_v3 = vmax.f32 %v300_v63, 0.0 }
  0x2f   : > { %1827 = vmatprep.mubr.msk.f32.mxu1 %vm372_vm0, %v341_v38  ;;  %v357_v38 = vmax.f32 %v293_v34, 0.0 }
  0x31   : > { %1780 = vmatmul.mubr.msk.f32.gmra.mrb[6].mxu0 %vm372_vm0, %v310_v37  ;;  %v326_v37 = vmax.f32 %v262_v33, 0.0 }
  0x32   : > { %1782 = vmatprep.mubr.msk.f32.mxu0 %vm372_vm0, %v311_v40  ;;  %1828 = vmatmul.mubr.msk.f32.gmra.mrb[6].mxu1 %vm372_vm0, %v342_v44  ;;  %v327_v40 = vmax.f32 %v263_v35, 0.0  ;;  %v358_v44 = vmax.f32 %v294_v39, 0.0 }
  0x33   : > { %1830 = vmatprep.mubr.msk.f32.mxu1 %vm372_vm0, %v343_v46  ;;  %v359_v46 = vmax.f32 %v295_v42, 0.0 }
  0x35   : > { %1783 = vmatmul.mubr.msk.f32.gmra.mrb[8].mxu0 %vm372_vm0, %v312_v45  ;;  %v328_v45 = vmax.f32 %v264_v41, 0.0 }
  0x36   : > { %1785 = vmatprep.mubr.msk.f32.mxu0 %vm372_vm0, %v313_v48  ;;  %1831 = vmatmul.mubr.msk.f32.gmra.mrb[8].mxu1 %vm372_vm0, %v344_v52  ;;  %v329_v48 = vmax.f32 %v265_v43, 0.0  ;;  %v360_v52 = vmax.f32 %v296_v47, 0.0 }
  0x37   : > { %1833 = vmatprep.mubr.msk.f32.mxu1 %vm372_vm0, %v345_v54  ;;  %v361_v54 = vmax.f32 %v297_v50, 0.0 }
  0x39   : > { %1786 = vmatmul.mubr.msk.f32.gmra.mrb[10].mxu0 %vm372_vm0, %v314_v53  ;;  %v330_v53 = vmax.f32 %v266_v49, 0.0 }
  0x3a   : > { %1788 = vmatprep.mubr.msk.f32.mxu0 %vm372_vm0, %v315_v56  ;;  %1834 = vmatmul.mubr.msk.f32.gmra.mrb[10].mxu1 %vm372_vm0, %v346_v60  ;;  %v331_v56 = vmax.f32 %v267_v51, 0.0  ;;  %v362_v60 = vmax.f32 %v298_v55, 0.0 }
  0x3b   : > { %1836 = vmatprep.mubr.msk.f32.mxu1 %vm372_vm0, %v347_v62  ;;  %v363_v62 = vmax.f32 %v299_v58, 0.0 }
  0x3d   : > { %1789 = vmatmul.mubr.msk.f32.gmra.mrb[12].mxu0 %vm372_vm0, %v316_v61  ;;  %v332_v61 = vmax.f32 %v268_v57, 0.0 }
  0x3e   : > { %1791 = vmatprep.mubr.msk.f32.mxu0 %vm372_vm0, %v317_v0  ;;  %1837 = vmatmul.mubr.msk.f32.gmra.mrb[12].mxu1 %vm372_vm0, %v348_v4  ;;  %v333_v0 = vmax.f32 %v269_v59, 0.0  ;;  %v334_v4 = vmax.f32 %v270_v1, 0.0 }
  0x3f   : > { %1839 = vmatprep.mubr.msk.f32.mxu1 %vm372_vm0, %v349_v6  ;;  %v302_v6 = vld [vmem:[%s2674_s0 + $0x1f8] sm:$0xff] }
  0x40   : > { %v366_v7 = vmax.f32 %v302_v6, 0.0 }
  0x41   : > { %1792 = vmatmul.mubr.msk.f32.gmra.mrb[14].mxu0 %vm372_vm0, %v318_v5  ;;  %v365_v5 = vmax.f32 %v301_v2, 0.0 }
  0x42   : > { %1794 = vmatprep.mubr.msk.f32.mxu0 %vm372_vm0, %v319_v8  ;;  %1840 = vmatmul.mubr.msk.f32.gmra.mrb[14].mxu1 %vm372_vm0, %v350_v12 }
  0x43   : > { %1842 = vmatprep.mubr.msk.f32.mxu1 %vm372_vm0, %v351_v14 }
  0x45   : > { %1795 = vmatmul.mubr.msk.f32.gmra.mrb[16].mxu0 %vm372_vm0, %v320_v13 }
  0x46   : > { %1797 = vmatprep.mubr.msk.f32.mxu0 %vm372_vm0, %v321_v16  ;;  %1843 = vmatmul.mubr.msk.f32.gmra.mrb[16].mxu1 %vm372_vm0, %v352_v20 }
  0x47   : > { %1845 = vmatprep.mubr.msk.f32.mxu1 %vm372_vm0, %v353_v22 }
  0x49   : > { %1798 = vmatmul.mubr.msk.f32.gmra.mrb[18].mxu0 %vm372_vm0, %v322_v21 }
  0x4a   : > { %1800 = vmatprep.mubr.msk.f32.mxu0 %vm372_vm0, %v323_v24  ;;  %1846 = vmatmul.mubr.msk.f32.gmra.mrb[18].mxu1 %vm372_vm0, %v354_v28 }
  0x4b   : > { %1848 = vmatprep.mubr.msk.f32.mxu1 %vm372_vm0, %v355_v30 }
  0x4d   : > { %1801 = vmatmul.mubr.msk.f32.gmra.mrb[20].mxu0 %vm372_vm0, %v324_v29 }
  0x4e   : > { %1803 = vmatprep.mubr.msk.f32.mxu0 %vm372_vm0, %v325_v32  ;;  %1849 = vmatmul.mubr.msk.f32.gmra.mrb[20].mxu1 %vm372_vm0, %v356_v36 }
  0x4f   : > { %1851 = vmatprep.mubr.msk.f32.mxu1 %vm372_vm0, %v357_v38 }
  0x51   : > { %1804 = vmatmul.mubr.msk.f32.gmra.mrb[22].mxu0 %vm372_vm0, %v326_v37 }
  0x52   : > { %1806 = vmatprep.mubr.msk.f32.mxu0 %vm372_vm0, %v327_v40  ;;  %1852 = vmatmul.mubr.msk.f32.gmra.mrb[22].mxu1 %vm372_vm0, %v358_v44 }
  0x53   : > { %1854 = vmatprep.mubr.msk.f32.mxu1 %vm372_vm0, %v359_v46 }
  0x55   : > { %1807 = vmatmul.mubr.msk.f32.gmra.mrb[24].mxu0 %vm372_vm0, %v328_v45 }
  0x56   : > { %1809 = vmatprep.mubr.msk.f32.mxu0 %vm372_vm0, %v329_v48  ;;  %1855 = vmatmul.mubr.msk.f32.gmra.mrb[24].mxu1 %vm372_vm0, %v360_v52 }
  0x57   : > { %1857 = vmatprep.mubr.msk.f32.mxu1 %vm372_vm0, %v361_v54 }
  0x59   : > { %1810 = vmatmul.mubr.msk.f32.gmra.mrb[26].mxu0 %vm372_vm0, %v330_v53 }
  0x5a   : > { %1812 = vmatprep.mubr.msk.f32.mxu0 %vm372_vm0, %v331_v56  ;;  %1858 = vmatmul.mubr.msk.f32.gmra.mrb[26].mxu1 %vm372_vm0, %v362_v60 }
  0x5b   : > { %1860 = vmatprep.mubr.msk.f32.mxu1 %vm372_vm0, %v363_v62 }
  0x5d   : > { %1813 = vmatmul.mubr.msk.f32.gmra.mrb[28].mxu0 %vm372_vm0, %v332_v61 }
  0x5e   : > { %1815 = vmatprep.mubr.msk.f32.mxu0 %vm372_vm0, %v333_v0  ;;  %1861 = vmatmul.mubr.msk.f32.gmra.mrb[28].mxu1 %vm372_vm0, %v364_v3 }
  0x5f   : > { %1863 = vmatprep.mubr.msk.f32.mxu1 %vm372_vm0, %v365_v5 }
  0x61   : > { %1816 = vmatmul.mubr.msk.f32.gmra.mrb[30].mxu0 %vm372_vm0, %v334_v4 }
  0x62   : > { %1864 = vmatmul.mubr.msk.f32.gmra.mrb[30].mxu1 %vm372_vm0, %v366_v7 }
  0xf8   : > { %v1772_v8 = vpop.f32.mrb[0].mxu0 }
  0xf9   : > { %957 = vst [vmem:[#allocation2 + $0x8] sm:$0xff] %v1772_v8  ;;  %v1094_v9 = vmul.f32 %v1772_v8, %v1772_v8  ;;  %v635_v10 = vpop.f32.mrb[1].mxu0  ;;  %v2305_v13 = vpop.f32.mrb[0].mxu1 }
  0xfa   : > { %956 = vst [vmem:[#allocation2] sm:$0xff] %v635_v10  ;;  %v1021_v11 = vadd.f32 %v1772_v8, %v635_v10  ;;  %v1093_v12 = vmul.f32 %v635_v10, %v635_v10  ;;  %989 = vst [vmem:[#allocation2 + $0x108] sm:$0xff] %v2305_v13  ;;  %v2308_v16 = vpop.f32.mrb[1].mxu1 }
  0xfb   : > { %988 = vst [vmem:[#allocation2 + $0x100] sm:$0xff] %v2308_v16 }
  0xfc   : > { %v1157_v14 = vadd.f32 %v1094_v9, %v1093_v12  ;;  %v1775_v15 = vpop.f32.mrb[2].mxu0 }
  0xfd   : > { %959 = vst [vmem:[#allocation2 + $0x18] sm:$0xff] %v1775_v15  ;;  %v645_v17 = vpop.f32.mrb[3].mxu0  ;;  %v2311_v20 = vpop.f32.mrb[2].mxu1  ;;  %v1096_v21 = vmul.f32 %v1775_v15, %v1775_v15 }
  0xfe   : > { %958 = vst [vmem:[#allocation2 + $0x10] sm:$0xff] %v645_v17  ;;  %v1022_v18 = vadd.f32 %v1021_v11, %v645_v17  ;;  %v1095_v19 = vmul.f32 %v645_v17, %v645_v17  ;;  %991 = vst [vmem:[#allocation2 + $0x118] sm:$0xff] %v2311_v20  ;;  %v2314_v25 = vpop.f32.mrb[3].mxu1 }
  0xff   : > { %990 = vst [vmem:[#allocation2 + $0x110] sm:$0xff] %v2314_v25 }
 0x100   : > { %v1158_v22 = vadd.f32 %v1157_v14, %v1095_v19  ;;  %v1778_v23 = vpop.f32.mrb[4].mxu0  ;;  %v1023_v24 = vadd.f32 %v1775_v15, %v1022_v18 }
 0x101   : > { %961 = vst [vmem:[#allocation2 + $0x28] sm:$0xff] %v1778_v23  ;;  %v655_v26 = vpop.f32.mrb[5].mxu0  ;;  %v2317_v30 = vpop.f32.mrb[4].mxu1  ;;  %v1098_v31 = vmul.f32 %v1778_v23, %v1778_v23 }
 0x102   : > { %960 = vst [vmem:[#allocation2 + $0x20] sm:$0xff] %v655_v26  ;;  %v1024_v27 = vadd.f32 %v1023_v24, %v655_v26  ;;  %v1097_v28 = vmul.f32 %v655_v26, %v655_v26  ;;  %v1159_v29 = vadd.f32 %v1158_v22, %v1096_v21  ;;  %993 = vst [vmem:[#allocation2 + $0x128] sm:$0xff] %v2317_v30  ;;  %v2320_v35 = vpop.f32.mrb[5].mxu1 }
 0x103   : > { %992 = vst [vmem:[#allocation2 + $0x120] sm:$0xff] %v2320_v35 }
 0x104   : > { %v1160_v32 = vadd.f32 %v1159_v29, %v1097_v28  ;;  %v1781_v33 = vpop.f32.mrb[6].mxu0  ;;  %v1025_v34 = vadd.f32 %v1778_v23, %v1024_v27 }
 0x105   : > { %963 = vst [vmem:[#allocation2 + $0x38] sm:$0xff] %v1781_v33  ;;  %v665_v36 = vpop.f32.mrb[7].mxu0  ;;  %v2323_v40 = vpop.f32.mrb[6].mxu1  ;;  %v1100_v41 = vmul.f32 %v1781_v33, %v1781_v33 }
 0x106   : > { %962 = vst [vmem:[#allocation2 + $0x30] sm:$0xff] %v665_v36  ;;  %v1026_v37 = vadd.f32 %v1025_v34, %v665_v36  ;;  %v1099_v38 = vmul.f32 %v665_v36, %v665_v36  ;;  %v1161_v39 = vadd.f32 %v1160_v32, %v1098_v31  ;;  %995 = vst [vmem:[#allocation2 + $0x138] sm:$0xff] %v2323_v40  ;;  %v2326_v45 = vpop.f32.mrb[7].mxu1 }
 0x107   : > { %994 = vst [vmem:[#allocation2 + $0x130] sm:$0xff] %v2326_v45 }
 0x108   : > { %v1162_v42 = vadd.f32 %v1161_v39, %v1099_v38  ;;  %v1784_v43 = vpop.f32.mrb[8].mxu0  ;;  %v1027_v44 = vadd.f32 %v1781_v33, %v1026_v37 }
 0x109   : > { %965 = vst [vmem:[#allocation2 + $0x48] sm:$0xff] %v1784_v43  ;;  %v675_v46 = vpop.f32.mrb[9].mxu0  ;;  %v2329_v50 = vpop.f32.mrb[8].mxu1  ;;  %v1102_v51 = vmul.f32 %v1784_v43, %v1784_v43 }
 0x10a   : > { %964 = vst [vmem:[#allocation2 + $0x40] sm:$0xff] %v675_v46  ;;  %v1028_v47 = vadd.f32 %v1027_v44, %v675_v46  ;;  %v1101_v48 = vmul.f32 %v675_v46, %v675_v46  ;;  %v1163_v49 = vadd.f32 %v1162_v42, %v1100_v41  ;;  %997 = vst [vmem:[#allocation2 + $0x148] sm:$0xff] %v2329_v50  ;;  %v2332_v55 = vpop.f32.mrb[9].mxu1 }
 0x10b   : > { %996 = vst [vmem:[#allocation2 + $0x140] sm:$0xff] %v2332_v55 }
 0x10c   : > { %v1164_v52 = vadd.f32 %v1163_v49, %v1101_v48  ;;  %v1787_v53 = vpop.f32.mrb[10].mxu0  ;;  %v1029_v54 = vadd.f32 %v1784_v43, %v1028_v47 }
 0x10d   : > { %967 = vst [vmem:[#allocation2 + $0x58] sm:$0xff] %v1787_v53  ;;  %v685_v56 = vpop.f32.mrb[11].mxu0  ;;  %v2335_v60 = vpop.f32.mrb[10].mxu1  ;;  %v1104_v61 = vmul.f32 %v1787_v53, %v1787_v53 }
 0x10e   : > { %966 = vst [vmem:[#allocation2 + $0x50] sm:$0xff] %v685_v56  ;;  %v1030_v57 = vadd.f32 %v1029_v54, %v685_v56  ;;  %v1103_v58 = vmul.f32 %v685_v56, %v685_v56  ;;  %v1165_v59 = vadd.f32 %v1164_v52, %v1102_v51  ;;  %999 = vst [vmem:[#allocation2 + $0x158] sm:$0xff] %v2335_v60  ;;  %v2338_v1 = vpop.f32.mrb[11].mxu1 }
 0x10f   : > { %998 = vst [vmem:[#allocation2 + $0x150] sm:$0xff] %v2338_v1 }
 0x110   : > { %v1166_v62 = vadd.f32 %v1165_v59, %v1103_v58  ;;  %v1790_v63 = vpop.f32.mrb[12].mxu0  ;;  %v1031_v0 = vadd.f32 %v1787_v53, %v1030_v57 }
 0x111   : > { %969 = vst [vmem:[#allocation2 + $0x68] sm:$0xff] %v1790_v63  ;;  %v695_v2 = vpop.f32.mrb[13].mxu0  ;;  %v2341_v6 = vpop.f32.mrb[12].mxu1  ;;  %v1106_v7 = vmul.f32 %v1790_v63, %v1790_v63 }
 0x112   : > { %968 = vst [vmem:[#allocation2 + $0x60] sm:$0xff] %v695_v2  ;;  %v1032_v3 = vadd.f32 %v1031_v0, %v695_v2  ;;  %v1105_v4 = vmul.f32 %v695_v2, %v695_v2  ;;  %v1167_v5 = vadd.f32 %v1166_v62, %v1104_v61  ;;  %1001 = vst [vmem:[#allocation2 + $0x168] sm:$0xff] %v2341_v6  ;;  %v2344_v11 = vpop.f32.mrb[13].mxu1 }
 0x113   : > { %1000 = vst [vmem:[#allocation2 + $0x160] sm:$0xff] %v2344_v11 }
 0x114   : > { %v1168_v8 = vadd.f32 %v1167_v5, %v1105_v4  ;;  %v1793_v9 = vpop.f32.mrb[14].mxu0  ;;  %v1033_v10 = vadd.f32 %v1790_v63, %v1032_v3 }
 0x115   : > { %971 = vst [vmem:[#allocation2 + $0x78] sm:$0xff] %v1793_v9  ;;  %v705_v12 = vpop.f32.mrb[15].mxu0  ;;  %v2347_v18 = vpop.f32.mrb[14].mxu1  ;;  %v1108_v19 = vmul.f32 %v1793_v9, %v1793_v9 }
 0x116   : > { %970 = vst [vmem:[#allocation2 + $0x70] sm:$0xff] %v705_v12  ;;  %v1034_v14 = vadd.f32 %v1033_v10, %v705_v12  ;;  %v1107_v15 = vmul.f32 %v705_v12, %v705_v12  ;;  %v1169_v17 = vadd.f32 %v1168_v8, %v1106_v7  ;;  %1003 = vst [vmem:[#allocation2 + $0x178] sm:$0xff] %v2347_v18  ;;  %v2350_v24 = vpop.f32.mrb[15].mxu1 }
 0x117   : > { %1002 = vst [vmem:[#allocation2 + $0x170] sm:$0xff] %v2350_v24 }
 0x118   : > { %v1170_v21 = vadd.f32 %v1169_v17, %v1107_v15  ;;  %v1796_v22 = vpop.f32.mrb[16].mxu0  ;;  %v1035_v23 = vadd.f32 %v1793_v9, %v1034_v14 }
 0x119   : > { %973 = vst [vmem:[#allocation2 + $0x88] sm:$0xff] %v1796_v22  ;;  %v715_v26 = vpop.f32.mrb[17].mxu0  ;;  %v2353_v31 = vpop.f32.mrb[16].mxu1  ;;  %v1110_v32 = vmul.f32 %v1796_v22, %v1796_v22 }
 0x11a   : > { %972 = vst [vmem:[#allocation2 + $0x80] sm:$0xff] %v715_v26  ;;  %v1036_v27 = vadd.f32 %v1035_v23, %v715_v26  ;;  %v1109_v28 = vmul.f32 %v715_v26, %v715_v26  ;;  %v1171_v29 = vadd.f32 %v1170_v21, %v1108_v19  ;;  %1005 = vst [vmem:[#allocation2 + $0x188] sm:$0xff] %v2353_v31  ;;  %v2356_v37 = vpop.f32.mrb[17].mxu1 }
 0x11b   : > { %1004 = vst [vmem:[#allocation2 + $0x180] sm:$0xff] %v2356_v37 }
 0x11c   : > { %v1172_v33 = vadd.f32 %v1171_v29, %v1109_v28  ;;  %v1799_v34 = vpop.f32.mrb[18].mxu0  ;;  %v1037_v36 = vadd.f32 %v1796_v22, %v1036_v27 }
 0x11d   : > { %975 = vst [vmem:[#allocation2 + $0x98] sm:$0xff] %v1799_v34  ;;  %v725_v38 = vpop.f32.mrb[19].mxu0  ;;  %v2359_v43 = vpop.f32.mrb[18].mxu1  ;;  %v1112_v44 = vmul.f32 %v1799_v34, %v1799_v34 }
 0x11e   : > { %974 = vst [vmem:[#allocation2 + $0x90] sm:$0xff] %v725_v38  ;;  %v1038_v39 = vadd.f32 %v1037_v36, %v725_v38  ;;  %v1111_v41 = vmul.f32 %v725_v38, %v725_v38  ;;  %v1173_v42 = vadd.f32 %v1172_v33, %v1110_v32  ;;  %1007 = vst [vmem:[#allocation2 + $0x198] sm:$0xff] %v2359_v43  ;;  %v2362_v49 = vpop.f32.mrb[19].mxu1 }
 0x11f   : > { %1006 = vst [vmem:[#allocation2 + $0x190] sm:$0xff] %v2362_v49 }
 0x120   : > { %v1174_v46 = vadd.f32 %v1173_v42, %v1111_v41  ;;  %v1802_v47 = vpop.f32.mrb[20].mxu0  ;;  %v1039_v48 = vadd.f32 %v1799_v34, %v1038_v39 }
 0x121   : > { %977 = vst [vmem:[#allocation2 + $0xa8] sm:$0xff] %v1802_v47  ;;  %v735_v51 = vpop.f32.mrb[21].mxu0  ;;  %v2365_v56 = vpop.f32.mrb[20].mxu1  ;;  %v1114_v57 = vmul.f32 %v1802_v47, %v1802_v47 }
 0x122   : > { %976 = vst [vmem:[#allocation2 + $0xa0] sm:$0xff] %v735_v51  ;;  %v1040_v52 = vadd.f32 %v1039_v48, %v735_v51  ;;  %v1113_v53 = vmul.f32 %v735_v51, %v735_v51  ;;  %v1175_v54 = vadd.f32 %v1174_v46, %v1112_v44  ;;  %1009 = vst [vmem:[#allocation2 + $0x1a8] sm:$0xff] %v2365_v56  ;;  %v2368_v62 = vpop.f32.mrb[21].mxu1 }
 0x123   : > { %1008 = vst [vmem:[#allocation2 + $0x1a0] sm:$0xff] %v2368_v62 }
 0x124   : > { %v1176_v58 = vadd.f32 %v1175_v54, %v1113_v53  ;;  %v1805_v59 = vpop.f32.mrb[22].mxu0  ;;  %v1041_v61 = vadd.f32 %v1802_v47, %v1040_v52 }
 0x125   : > { %979 = vst [vmem:[#allocation2 + $0xb8] sm:$0xff] %v1805_v59  ;;  %v745_v63 = vpop.f32.mrb[23].mxu0  ;;  %v2371_v4 = vpop.f32.mrb[22].mxu1  ;;  %v1116_v5 = vmul.f32 %v1805_v59, %v1805_v59 }
 0x126   : > { %978 = vst [vmem:[#allocation2 + $0xb0] sm:$0xff] %v745_v63  ;;  %v1042_v0 = vadd.f32 %v1041_v61, %v745_v63  ;;  %v1115_v2 = vmul.f32 %v745_v63, %v745_v63  ;;  %v1177_v3 = vadd.f32 %v1176_v58, %v1114_v57  ;;  %1011 = vst [vmem:[#allocation2 + $0x1b8] sm:$0xff] %v2371_v4  ;;  %v2374_v10 = vpop.f32.mrb[23].mxu1 }
 0x127   : > { %1010 = vst [vmem:[#allocation2 + $0x1b0] sm:$0xff] %v2374_v10 }
 0x128   : > { %v1178_v7 = vadd.f32 %v1177_v3, %v1115_v2  ;;  %v1808_v8 = vpop.f32.mrb[24].mxu0  ;;  %v1043_v9 = vadd.f32 %v1805_v59, %v1042_v0 }
 0x129   : > { %981 = vst [vmem:[#allocation2 + $0xc8] sm:$0xff] %v1808_v8  ;;  %v755_v12 = vpop.f32.mrb[25].mxu0  ;;  %v2377_v19 = vpop.f32.mrb[24].mxu1  ;;  %v1118_v21 = vmul.f32 %v1808_v8, %v1808_v8 }
 0x12a   : > { %980 = vst [vmem:[#allocation2 + $0xc0] sm:$0xff] %v755_v12  ;;  %v1044_v14 = vadd.f32 %v1043_v9, %v755_v12  ;;  %v1117_v15 = vmul.f32 %v755_v12, %v755_v12  ;;  %v1179_v17 = vadd.f32 %v1178_v7, %v1116_v5  ;;  %1013 = vst [vmem:[#allocation2 + $0x1c8] sm:$0xff] %v2377_v19  ;;  %v2380_v27 = vpop.f32.mrb[25].mxu1 }
 0x12b   : > { %1012 = vst [vmem:[#allocation2 + $0x1c0] sm:$0xff] %v2380_v27 }
 0x12c   : > { %v1180_v22 = vadd.f32 %v1179_v17, %v1117_v15  ;;  %v1811_v23 = vpop.f32.mrb[26].mxu0  ;;  %v1045_v26 = vadd.f32 %v1808_v8, %v1044_v14  ;;  %v1125_v8 = vmul.f32 %v2308_v16, %v2308_v16  ;;  %v1126_v15 = vmul.f32 %v2305_v13, %v2305_v13 }
 0x12d   : > { %983 = vst [vmem:[#allocation2 + $0xd8] sm:$0xff] %v1811_v23  ;;  %v765_v28 = vpop.f32.mrb[27].mxu0  ;;  %v2383_v34 = vpop.f32.mrb[26].mxu1  ;;  %v1120_v36 = vmul.f32 %v1811_v23, %v1811_v23 }
 0x12e   : > { %982 = vst [vmem:[#allocation2 + $0xd0] sm:$0xff] %v765_v28  ;;  %v1046_v29 = vadd.f32 %v1045_v26, %v765_v28  ;;  %v1119_v32 = vmul.f32 %v765_v28, %v765_v28  ;;  %v1181_v33 = vadd.f32 %v1180_v22, %v1118_v21  ;;  %1015 = vst [vmem:[#allocation2 + $0x1d8] sm:$0xff] %v2383_v34  ;;  %v2386_v42 = vpop.f32.mrb[27].mxu1 }
 0x12f   : > { %1014 = vst [vmem:[#allocation2 + $0x1d0] sm:$0xff] %v2386_v42  ;;  %v1127_v22 = vmul.f32 %v2314_v25, %v2314_v25  ;;  %v1128_v28 = vmul.f32 %v2311_v20, %v2311_v20 }
 0x130   : > { %v1182_v38 = vadd.f32 %v1181_v33, %v1119_v32  ;;  %v1814_v39 = vpop.f32.mrb[28].mxu0  ;;  %v1047_v41 = vadd.f32 %v1811_v23, %v1046_v29 }
 0x131   : > { %985 = vst [vmem:[#allocation2 + $0xe8] sm:$0xff] %v1814_v39  ;;  %v775_v44 = vpop.f32.mrb[29].mxu0  ;;  %v2389_v51 = vpop.f32.mrb[28].mxu1  ;;  %v1122_v52 = vmul.f32 %v1814_v39, %v1814_v39 }
 0x132   : > { %984 = vst [vmem:[#allocation2 + $0xe0] sm:$0xff] %v775_v44  ;;  %v1048_v46 = vadd.f32 %v1047_v41, %v775_v44  ;;  %v1121_v47 = vmul.f32 %v775_v44, %v775_v44  ;;  %v1183_v48 = vadd.f32 %v1182_v38, %v1120_v36  ;;  %1017 = vst [vmem:[#allocation2 + $0x1e8] sm:$0xff] %v2389_v51  ;;  %v2392_v58 = vpop.f32.mrb[29].mxu1 }
 0x133   : > { %1016 = vst [vmem:[#allocation2 + $0x1e0] sm:$0xff] %v2392_v58 }
 0x134   : > { %v1184_v53 = vadd.f32 %v1183_v48, %v1121_v47  ;;  %v1817_v54 = vpop.f32.mrb[30].mxu0  ;;  %v1049_v57 = vadd.f32 %v1814_v39, %v1048_v46 }
 0x135   : > { %987 = vst [vmem:[#allocation2 + $0xf8] sm:$0xff] %v1817_v54  ;;  %v785_v59 = vpop.f32.mrb[31].mxu0  ;;  %v2395_v2 = vpop.f32.mrb[30].mxu1  ;;  %v1124_v3 = vmul.f32 %v1817_v54, %v1817_v54 }
 0x136   : > { %986 = vst [vmem:[#allocation2 + $0xf0] sm:$0xff] %v785_v59  ;;  %v1050_v61 = vadd.f32 %v1049_v57, %v785_v59  ;;  %v1123_v63 = vmul.f32 %v785_v59, %v785_v59  ;;  %v1185_v0 = vadd.f32 %v1184_v53, %v1122_v52  ;;  %1019 = vst [vmem:[#allocation2 + $0x1f8] sm:$0xff] %v2395_v2  ;;  %v2400_v9 = vpop.f32.mrb[31].mxu1 }
 0x137   : > { %1018 = vst [vmem:[#allocation2 + $0x1f0] sm:$0xff] %v2400_v9 }
 0x138   : > { %v1051_v5 = vadd.f32 %v1817_v54, %v1050_v61  ;;  %v1186_v7 = vadd.f32 %v1185_v0, %v1123_v63 }
 0x13a   : > { %v1187_v12 = vadd.f32 %v1186_v7, %v1124_v3  ;;  %v1052_v14 = vadd.f32 %v1051_v5, %v2308_v16  ;;  %v1129_v16 = vmul.f32 %v2320_v35, %v2320_v35 }
 0x13c   : > { %v1188_v17 = vadd.f32 %v1187_v12, %v1125_v8  ;;  %v1053_v21 = vadd.f32 %v2305_v13, %v1052_v14  ;;  %v1130_v13 = vmul.f32 %v2317_v30, %v2317_v30 }
 0x13e   : > { %v1054_v23 = vadd.f32 %v1053_v21, %v2314_v25  ;;  %v1189_v26 = vadd.f32 %v1188_v17, %v1126_v15  ;;  %v1131_v25 = vmul.f32 %v2326_v45, %v2326_v45 }
 0x140   : > { %v1190_v29 = vadd.f32 %v1189_v26, %v1127_v22  ;;  %v1055_v32 = vadd.f32 %v2311_v20, %v1054_v23  ;;  %v1132_v20 = vmul.f32 %v2323_v40, %v2323_v40 }
 0x142   : > { %v1056_v33 = vadd.f32 %v1055_v32, %v2320_v35  ;;  %v1191_v36 = vadd.f32 %v1190_v29, %v1128_v28  ;;  %v1133_v35 = vmul.f32 %v2332_v55, %v2332_v55 }
 0x144   : > { %v1192_v38 = vadd.f32 %v1191_v36, %v1129_v16  ;;  %v1057_v39 = vadd.f32 %v2317_v30, %v1056_v33  ;;  %v1134_v30 = vmul.f32 %v2329_v50, %v2329_v50 }
 0x146   : > { %v1058_v41 = vadd.f32 %v1057_v39, %v2326_v45  ;;  %v1193_v44 = vadd.f32 %v1192_v38, %v1130_v13  ;;  %v1135_v45 = vmul.f32 %v2338_v1, %v2338_v1 }
 0x148   : > { %v1194_v46 = vadd.f32 %v1193_v44, %v1131_v25  ;;  %v1059_v47 = vadd.f32 %v2323_v40, %v1058_v41  ;;  %v1136_v40 = vmul.f32 %v2335_v60, %v2335_v60 }
 0x14a   : > { %v1060_v48 = vadd.f32 %v1059_v47, %v2332_v55  ;;  %v1195_v52 = vadd.f32 %v1194_v46, %v1132_v20  ;;  %v1137_v55 = vmul.f32 %v2344_v11, %v2344_v11 }
 0x14c   : > { %v1196_v53 = vadd.f32 %v1195_v52, %v1133_v35  ;;  %v1061_v54 = vadd.f32 %v2329_v50, %v1060_v48  ;;  %v1138_v50 = vmul.f32 %v2341_v6, %v2341_v6 }
 0x14e   : > { %v1062_v57 = vadd.f32 %v1061_v54, %v2338_v1  ;;  %v1197_v59 = vadd.f32 %v1196_v53, %v1134_v30  ;;  %v1139_v1 = vmul.f32 %v2350_v24, %v2350_v24 }
 0x150   : > { %v1198_v61 = vadd.f32 %v1197_v59, %v1135_v45  ;;  %v1063_v63 = vadd.f32 %v2335_v60, %v1062_v57  ;;  %v1140_v60 = vmul.f32 %v2347_v18, %v2347_v18 }
 0x152   : > { %v1064_v0 = vadd.f32 %v1063_v63, %v2344_v11  ;;  %v1199_v3 = vadd.f32 %v1198_v61, %v1136_v40  ;;  %v1141_v11 = vmul.f32 %v2356_v37, %v2356_v37 }
 0x154   : > { %v1200_v5 = vadd.f32 %v1199_v3, %v1137_v55  ;;  %v1065_v7 = vadd.f32 %v2341_v6, %v1064_v0  ;;  %v1142_v6 = vmul.f32 %v2353_v31, %v2353_v31 }
 0x156   : > { %v1066_v8 = vadd.f32 %v1065_v7, %v2350_v24  ;;  %v1201_v12 = vadd.f32 %v1200_v5, %v1138_v50  ;;  %v1143_v24 = vmul.f32 %v2362_v49, %v2362_v49 }
 0x158   : > { %v1202_v14 = vadd.f32 %v1201_v12, %v1139_v1  ;;  %v1067_v15 = vadd.f32 %v2347_v18, %v1066_v8  ;;  %v1144_v18 = vmul.f32 %v2359_v43, %v2359_v43  ;;  %v1020_v12 = vld [vmem:[#allocation3] sm:$0x1] }
 0x15a   : > { %v1068_v17 = vadd.f32 %v1067_v15, %v2356_v37  ;;  %v1203_v21 = vadd.f32 %v1202_v14, %v1140_v60  ;;  %v1145_v37 = vmul.f32 %v2368_v62, %v2368_v62  ;;  %v1092_v14 = vld [vmem:[#allocation4] sm:$0x1] }
 0x15c   : > { %v1204_v22 = vadd.f32 %v1203_v21, %v1141_v11  ;;  %v1069_v23 = vadd.f32 %v2353_v31, %v1068_v17  ;;  %v1146_v31 = vmul.f32 %v2365_v56, %v2365_v56 }
 0x15e   : > { %v1070_v26 = vadd.f32 %v1069_v23, %v2362_v49  ;;  %v1205_v28 = vadd.f32 %v1204_v22, %v1142_v6  ;;  %v1147_v49 = vmul.f32 %v2374_v10, %v2374_v10 }
 0x160   : > { %v1206_v29 = vadd.f32 %v1205_v28, %v1143_v24  ;;  %v1071_v32 = vadd.f32 %v2359_v43, %v1070_v26  ;;  %v1148_v43 = vmul.f32 %v2371_v4, %v2371_v4 }
 0x162   : > { %v1072_v16 = vadd.f32 %v1071_v32, %v2368_v62  ;;  %v1207_v33 = vadd.f32 %v1206_v29, %v1144_v18  ;;  %v1149_v62 = vmul.f32 %v2380_v27, %v2380_v27 }
 0x164   : > { %v1208_v36 = vadd.f32 %v1207_v33, %v1145_v37  ;;  %v1073_v13 = vadd.f32 %v2365_v56, %v1072_v16  ;;  %v1150_v56 = vmul.f32 %v2377_v19, %v2377_v19 }
 0x166   : > { %v1074_v38 = vadd.f32 %v1073_v13, %v2374_v10  ;;  %v1209_v39 = vadd.f32 %v1208_v36, %v1146_v31  ;;  %v1151_v10 = vmul.f32 %v2386_v42, %v2386_v42 }
 0x168   : > { %v1210_v25 = vadd.f32 %v1209_v39, %v1147_v49  ;;  %v1075_v41 = vadd.f32 %v2371_v4, %v1074_v38  ;;  %v1152_v4 = vmul.f32 %v2383_v34, %v2383_v34 }
 0x16a   : > { %v1076_v44 = vadd.f32 %v1075_v41, %v2380_v27  ;;  %v1211_v20 = vadd.f32 %v1210_v25, %v1148_v43  ;;  %v1153_v27 = vmul.f32 %v2392_v58, %v2392_v58 }
 0x16c   : > { %v1212_v46 = vadd.f32 %v1211_v20, %v1149_v62  ;;  %v1077_v47 = vadd.f32 %v2377_v19, %v1076_v44  ;;  %v1154_v19 = vmul.f32 %v2389_v51, %v2389_v51 }
 0x16e   : > { %v1078_v35 = vadd.f32 %v1077_v47, %v2386_v42  ;;  %v1213_v48 = vadd.f32 %v1212_v46, %v1150_v56  ;;  %v1155_v42 = vmul.f32 %v2400_v9, %v2400_v9 }
 0x170   : > { %v1214_v52 = vadd.f32 %v1213_v48, %v1151_v10  ;;  %v1079_v30 = vadd.f32 %v2383_v34, %v1078_v35  ;;  %v1156_v34 = vmul.f32 %v2395_v2, %v2395_v2 }
 0x172   : > { %v1080_v53 = vadd.f32 %v1079_v30, %v2392_v58  ;;  %v1215_v54 = vadd.f32 %v1214_v52, %v1152_v4 }
 0x174   : > { %v1216_v45 = vadd.f32 %v1215_v54, %v1153_v27  ;;  %v1081_v57 = vadd.f32 %v2389_v51, %v1080_v53 }
 0x176   : > { %v1082_v59 = vadd.f32 %v1081_v57, %v2400_v9  ;;  %v1217_v40 = vadd.f32 %v1216_v45, %v1154_v19 }
 0x178   : > { %v1083_v61 = vadd.f32 %v2395_v2, %v1082_v59  ;;  %v1218_v63 = vadd.f32 %v1217_v40, %v1155_v42 }
 0x17a   : > { %v1084_v58 = vrot.slane %v1083_v61, 4  ;;  %v1219_v55 = vadd.f32 %v1218_v63, %v1156_v34 }
 0x17c   : > { %v1085_v0 = vadd.f32 %v1084_v58, %v1083_v61  ;;  %v1220_v3 = vrot.slane %v1219_v55, 4 }
 0x17e   : > { %v1086_v50 = vrot.slane %v1085_v0, 2  ;;  %v1221_v5 = vadd.f32 %v1220_v3, %v1219_v55 }
 0x180   : > { %v1087_v7 = vadd.f32 %v1086_v50, %v1085_v0  ;;  %v1222_v51 = vrot.slane %v1221_v5, 2 }
 0x182   : > { %v1088_v1 = vrot.slane %v1087_v7, 1  ;;  %v1223_v8 = vadd.f32 %v1222_v51, %v1221_v5 }
 0x184   : > { %v1089_v60 = vadd.f32 %v1088_v1, %v1087_v7  ;;  %v1224_v9 = vrot.slane %v1223_v8, 1 }
 0x186   : > { %v1090_v15 = vadd.f32 %v1089_v60, %v1020_v12  ;;  %v1225_v11 = vadd.f32 %v1224_v9, %v1223_v8 }
 0x188   : > { %1091 = vst [vmem:[#allocation3] sm:$0x1] %v1090_v15  ;;  %v1226_v17 = vadd.f32 %v1225_v11, %v1092_v14 }
 0x18a   : > { %1227 = vst [vmem:[#allocation4] sm:$0x1] %v1226_v17 }
 0x18b PF: > { %1229 = sbr.rel (!%p228_p4) target bundleno = 426 (0x1aa), region = 48  ;;  %v1236_v28 = vld [vmem:[%s2676_s2] sm:$0x1] (%p228_p4) }
 0x18c   : > { %v1241_v32 = vld [vmem:[%s2677_s3] sm:$0x1] (%p228_p4) }
 0x18f   : > { %v1230_v2 = vld [vmem:[#allocation3] sm:$0x1] (%p228_p4) }
 0x190   : > { %v1231_v6 = vmul.f32 (%p228_p4), 0.001953125, %v1230_v2 }
 0x191   : > { %v1232_v21 = vld [vmem:[#allocation4] sm:$0x1] (%p228_p4) }
 0x192   : > { %v1233_v22 = vmul.f32 0.001953125, %v1232_v21  ;;  %v1234_v23 = vmul.f32 %v1231_v6, %v1231_v6 }
 0x194   : > { %v1235_v24 = vsub.f32 %v1233_v22, %v1234_v23 }
 0x196   : > { %v1237_v26 = vadd.f32 1e-05, %v1235_v24 }
 0x198   : > { %1919 = vrsqrt.f32 %v1237_v26 }
 0x1a2   : > { %v1920_v18 = vpop.eup %1919 }
 0x1a3   : > { %v1239_v29 = vmul.f32 %v1920_v18, %v1236_v28 }
 0x1a5   : > { %1240 = vst [vmem:[#allocation5] sm:$0x1] %v1239_v29  ;;  %v1242_v37 = vmul.f32 %v1239_v29, %v1231_v6 }
 0x1a7   : > { %v1243_v16 = vsub.f32 %v1241_v32, %v1242_v37 }
 0x1a9   : > { %1244 = vst [vmem:[#allocation6] sm:$0x1] %v1243_v16 }
 0x1aa PF: > { %p1683_p6 = scmp.ne.s32.totalorder %s1965_s15, 1 }
 0x1ab   : > { %v1251_v33 = vld [vmem:[#allocation2] sm:$0xff] (!%p1683_p6)  ;;  %v1252_v49 = vld [vmem:[#allocation2 + $0x8] sm:$0xff] (!%p1683_p6)  ;;  %v1253_v38 = vld [vmem:[#allocation2 + $0x10] sm:$0xff] (!%p1683_p6) }
 0x1ac   : > { %1248 = sbr.rel (%p1683_p6) target bundleno = 471 (0x1d7), region = 52  ;;  %v2506_v31 = vld [vmem:[#allocation5] ss:$0 sm:$0xff] (!%p1683_p6)  ;;  %v1254_v39 = vld [vmem:[#allocation2 + $0x18] sm:$0xff] (!%p1683_p6)  ;;  %v1256_v44 = vld [vmem:[#allocation2 + $0x28] sm:$0xff] (!%p1683_p6) }
 0x1ad   : > { %v1322_v13 = vmul.f32 (!%p1683_p6), %v2506_v31, %v1251_v33  ;;  %v1323_v43 = vmul.f32 (!%p1683_p6), %v2506_v31, %v1252_v49  ;;  %v1324_v25 = vmul.f32 (!%p1683_p6), %v2506_v31, %v1253_v38  ;;  %v1325_v41 = vmul.f32 (!%p1683_p6), %v2506_v31, %v1254_v39  ;;  %v1255_v62 = vld [vmem:[#allocation2 + $0x20] sm:$0xff] (!%p1683_p6)  ;;  %v1257_v20 = vld [vmem:[#allocation2 + $0x30] sm:$0xff] (!%p1683_p6)  ;;  %v1258_v35 = vld [vmem:[#allocation2 + $0x38] sm:$0xff] (!%p1683_p6) }
 0x1ae   : > { %v1326_v46 = vmul.f32 (!%p1683_p6), %v2506_v31, %v1255_v62  ;;  %v1327_v47 = vmul.f32 (!%p1683_p6), %v2506_v31, %v1256_v44  ;;  %v1328_v10 = vmul.f32 (!%p1683_p6), %v2506_v31, %v1257_v20  ;;  %v1259_v48 = vld [vmem:[#allocation2 + $0x40] sm:$0xff] (!%p1683_p6)  ;;  %v1260_v4 = vld [vmem:[#allocation2 + $0x48] sm:$0xff] (!%p1683_p6)  ;;  %v1329_v53 = vmul.f32 (!%p1683_p6), %v2506_v31, %v1258_v35  ;;  %v1261_v54 = vld [vmem:[#allocation2 + $0x50] sm:$0xff] (!%p1683_p6) }
 0x1af   : > { %v1262_v19 = vld [vmem:[#allocation2 + $0x58] sm:$0xff] (!%p1683_p6)  ;;  %v1263_v45 = vld [vmem:[#allocation2 + $0x60] sm:$0xff] (!%p1683_p6)  ;;  %v1330_v40 = vmul.f32 (!%p1683_p6), %v2506_v31, %v1259_v48  ;;  %v1264_v34 = vld [vmem:[#allocation2 + $0x68] sm:$0xff] (!%p1683_p6)  ;;  %v1331_v55 = vmul.f32 (!%p1683_p6), %v2506_v31, %v1260_v4  ;;  %v1332_v0 = vmul.f32 (!%p1683_p6), %v2506_v31, %v1261_v54 }
 0x1b0   : > { %v2508_v36 = vld [vmem:[#allocation6] ss:$0 sm:$0xff] (!%p1683_p6)  ;;  %v1265_v61 = vld [vmem:[#allocation2 + $0x70] sm:$0xff] (!%p1683_p6)  ;;  %v1266_v63 = vld [vmem:[#allocation2 + $0x78] sm:$0xff] (!%p1683_p6)  ;;  %v1333_v3 = vmul.f32 (!%p1683_p6), %v2506_v31, %v1262_v19  ;;  %v1334_v7 = vmul.f32 (!%p1683_p6), %v2506_v31, %v1263_v45  ;;  %v1335_v51 = vmul.f32 (!%p1683_p6), %v2506_v31, %v1264_v34 }
 0x1b1   : > { %v1393_v56 = vadd.f32 (!%p1683_p6), %v2508_v36, %v1322_v13  ;;  %v1394_v52 = vadd.f32 (!%p1683_p6), %v2508_v36, %v1323_v43  ;;  %v1395_v30 = vadd.f32 (!%p1683_p6), %v2508_v36, %v1324_v25  ;;  %v1396_v27 = vadd.f32 (!%p1683_p6), %v2508_v36, %v1325_v41  ;;  %v1267_v50 = vld [vmem:[#allocation2 + $0x80] sm:$0xff] (!%p1683_p6)  ;;  %v1268_v8 = vld [vmem:[#allocation2 + $0x88] sm:$0xff] (!%p1683_p6)  ;;  %v1269_v12 = vld [vmem:[#allocation2 + $0x90] sm:$0xff] (!%p1683_p6) }
 0x1b2   : > { %v1397_v57 = vadd.f32 (!%p1683_p6), %v2508_v36, %v1326_v46  ;;  %v1398_v42 = vadd.f32 (!%p1683_p6), %v2508_v36, %v1327_v47  ;;  %v1399_v59 = vadd.f32 (!%p1683_p6), %v2508_v36, %v1328_v10  ;;  %v1400_v58 = vadd.f32 (!%p1683_p6), %v2508_v36, %v1329_v53  ;;  %v1270_v60 = vld [vmem:[#allocation2 + $0x98] sm:$0xff] (!%p1683_p6)  ;;  %v1271_v17 = vld [vmem:[#allocation2 + $0xa0] sm:$0xff] (!%p1683_p6)  ;;  %v1272_v2 = vld [vmem:[#allocation2 + $0xa8] sm:$0xff] (!%p1683_p6) }
 0x1b3   : > { %1457 = vst [vmem:[#allocation7] sm:$0xff] %v1393_v56  ;;  %1458 = vst [vmem:[#allocation7 + $0x8] sm:$0xff] %v1394_v52  ;;  %v1401_v5 = vadd.f32 %v2508_v36, %v1330_v40  ;;  %v1336_v1 = vmul.f32 %v2506_v31, %v1265_v61  ;;  %v1402_v9 = vadd.f32 %v2508_v36, %v1331_v55  ;;  %v1273_v21 = vld [vmem:[#allocation2 + $0xb0] sm:$0xff]  ;;  %v1274_v26 = vld [vmem:[#allocation2 + $0xb8] sm:$0xff] }
 0x1b4   : > { %1459 = vst [vmem:[#allocation7 + $0x10] sm:$0xff] %v1395_v30  ;;  %1460 = vst [vmem:[#allocation7 + $0x18] sm:$0xff] %v1396_v27  ;;  %v1403_v14 = vadd.f32 %v2508_v36, %v1332_v0  ;;  %v1404_v15 = vadd.f32 %v2508_v36, %v1333_v3  ;;  %v1337_v11 = vmul.f32 %v2506_v31, %v1266_v63  ;;  %v1275_v37 = vld [vmem:[#allocation2 + $0xc0] sm:$0xff]  ;;  %v1276_v38 = vld [vmem:[#allocation2 + $0xc8] sm:$0xff] }
 0x1b5   : > { %1461 = vst [vmem:[#allocation7 + $0x20] sm:$0xff] %v1397_v57  ;;  %1462 = vst [vmem:[#allocation7 + $0x28] sm:$0xff] %v1398_v42  ;;  %v1405_v6 = vadd.f32 %v2508_v36, %v1334_v7  ;;  %v1406_v22 = vadd.f32 %v2508_v36, %v1335_v51  ;;  %v1407_v23 = vadd.f32 %v2508_v36, %v1336_v1  ;;  %v1277_v39 = vld [vmem:[#allocation2 + $0xd0] sm:$0xff]  ;;  %v1278_v43 = vld [vmem:[#allocation2 + $0xd8] sm:$0xff] }
 0x1b6   : > { %1463 = vst [vmem:[#allocation7 + $0x30] sm:$0xff] %v1399_v59  ;;  %1464 = vst [vmem:[#allocation7 + $0x38] sm:$0xff] %v1400_v58  ;;  %v1338_v24 = vmul.f32 %v2506_v31, %v1267_v50  ;;  %v1408_v28 = vadd.f32 %v2508_v36, %v1337_v11  ;;  %v1339_v18 = vmul.f32 %v2506_v31, %v1268_v8  ;;  %v1279_v20 = vld [vmem:[#allocation2 + $0xe0] sm:$0xff]  ;;  %v1280_v56 = vld [vmem:[#allocation2 + $0xe8] sm:$0xff] }
 0x1b7   : > { %1465 = vst [vmem:[#allocation7 + $0x40] sm:$0xff] %v1401_v5  ;;  %1466 = vst [vmem:[#allocation7 + $0x48] sm:$0xff] %v1402_v9  ;;  %v1340_v29 = vmul.f32 %v2506_v31, %v1269_v12  ;;  %v1341_v32 = vmul.f32 %v2506_v31, %v1270_v60  ;;  %v1342_v33 = vmul.f32 %v2506_v31, %v1271_v17  ;;  %v1281_v46 = vld [vmem:[#allocation2 + $0xf0] sm:$0xff]  ;;  %v1282_v4 = vld [vmem:[#allocation2 + $0xf8] sm:$0xff] }
 0x1b8   : > { %1467 = vst [vmem:[#allocation7 + $0x50] sm:$0xff] %v1403_v14  ;;  %1468 = vst [vmem:[#allocation7 + $0x58] sm:$0xff] %v1404_v15  ;;  %v1409_v16 = vadd.f32 %v2508_v36, %v1338_v24  ;;  %v1343_v13 = vmul.f32 %v2506_v31, %v1272_v2  ;;  %v1344_v49 = vmul.f32 %v2506_v31, %v1273_v21  ;;  %v1283_v54 = vld [vmem:[#allocation2 + $0x100] sm:$0xff]  ;;  %v1284_v59 = vld [vmem:[#allocation2 + $0x108] sm:$0xff] }
 0x1b9   : > { %1469 = vst [vmem:[#allocation7 + $0x60] sm:$0xff] %v1405_v6  ;;  %1470 = vst [vmem:[#allocation7 + $0x68] sm:$0xff] %v1406_v22  ;;  %v1410_v25 = vadd.f32 %v2508_v36, %v1339_v18  ;;  %v1411_v41 = vadd.f32 %v2508_v36, %v1340_v29  ;;  %v1412_v62 = vadd.f32 %v2508_v36, %v1341_v32  ;;  %v1285_v40 = vld [vmem:[#allocation2 + $0x110] sm:$0xff]  ;;  %v1286_v34 = vld [vmem:[#allocation2 + $0x118] sm:$0xff] }
 0x1ba   : > { %1471 = vst [vmem:[#allocation7 + $0x70] sm:$0xff] %v1407_v23  ;;  %1472 = vst [vmem:[#allocation7 + $0x78] sm:$0xff] %v1408_v28  ;;  %v1345_v44 = vmul.f32 %v2506_v31, %v1274_v26  ;;  %v1413_v47 = vadd.f32 %v2508_v36, %v1342_v33  ;;  %v1414_v10 = vadd.f32 %v2508_v36, %v1343_v13  ;;  %v1287_v0 = vld [vmem:[#allocation2 + $0x120] sm:$0xff]  ;;  %v1288_v3 = vld [vmem:[#allocation2 + $0x128] sm:$0xff] }
 0x1bb   : > { %1473 = vst [vmem:[#allocation7 + $0x80] sm:$0xff] %v1409_v16  ;;  %v1415_v35 = vadd.f32 %v2508_v36, %v1344_v49  ;;  %v1346_v48 = vmul.f32 %v2506_v31, %v1275_v37  ;;  %1474 = vst [vmem:[#allocation7 + $0x88] sm:$0xff] %v1410_v25  ;;  %v1347_v30 = vmul.f32 %v2506_v31, %v1276_v38  ;;  %v1289_v50 = vld [vmem:[#allocation2 + $0x130] sm:$0xff]  ;;  %v1290_v8 = vld [vmem:[#allocation2 + $0x138] sm:$0xff] }
 0x1bc   : > { %1475 = vst [vmem:[#allocation7 + $0x90] sm:$0xff] %v1411_v41  ;;  %1476 = vst [vmem:[#allocation7 + $0x98] sm:$0xff] %v1412_v62  ;;  %v1416_v52 = vadd.f32 %v2508_v36, %v1345_v44  ;;  %v1348_v27 = vmul.f32 %v2506_v31, %v1277_v39  ;;  %v1349_v53 = vmul.f32 %v2506_v31, %v1278_v43  ;;  %v1291_v15 = vld [vmem:[#allocation2 + $0x140] sm:$0xff]  ;;  %v1292_v6 = vld [vmem:[#allocation2 + $0x148] sm:$0xff] }
 0x1bd   : > { %1477 = vst [vmem:[#allocation7 + $0xa0] sm:$0xff] %v1413_v47  ;;  %1478 = vst [vmem:[#allocation7 + $0xa8] sm:$0xff] %v1414_v10  ;;  %v1417_v19 = vadd.f32 %v2508_v36, %v1346_v48  ;;  %v1350_v45 = vmul.f32 %v2506_v31, %v1279_v20  ;;  %v1351_v57 = vmul.f32 %v2506_v31, %v1280_v56  ;;  %v1293_v22 = vld [vmem:[#allocation2 + $0x150] sm:$0xff]  ;;  %v1294_v23 = vld [vmem:[#allocation2 + $0x158] sm:$0xff] }
 0x1be   : > { %1479 = vst [vmem:[#allocation7 + $0xb0] sm:$0xff] %v1415_v35  ;;  %v1352_v42 = vmul.f32 %v2506_v31, %v1281_v46  ;;  %1480 = vst [vmem:[#allocation7 + $0xb8] sm:$0xff] %v1416_v52  ;;  %v1418_v61 = vadd.f32 %v2508_v36, %v1347_v30  ;;  %v1419_v63 = vadd.f32 %v2508_v36, %v1348_v27  ;;  %v1295_v29 = vld [vmem:[#allocation2 + $0x160] sm:$0xff]  ;;  %v1296_v32 = vld [vmem:[#allocation2 + $0x168] sm:$0xff] }
 0x1bf   : > { %v1420_v58 = vadd.f32 %v2508_v36, %v1349_v53  ;;  %v1353_v55 = vmul.f32 %v2506_v31, %v1282_v4  ;;  %1481 = vst [vmem:[#allocation7 + $0xc0] sm:$0xff] %v1417_v19  ;;  %v1421_v5 = vadd.f32 %v2508_v36, %v1350_v45  ;;  %v1422_v7 = vadd.f32 %v2508_v36, %v1351_v57  ;;  %v1297_v37 = vld [vmem:[#allocation2 + $0x170] sm:$0xff]  ;;  %v1298_v38 = vld [vmem:[#allocation2 + $0x178] sm:$0xff]  ;;  %v1299_v62 = vld [vmem:[#allocation2 + $0x180] sm:$0xff] }
 0x1c0   : > { %v1423_v51 = vadd.f32 %v2508_v36, %v1352_v42  ;;  %v1354_v1 = vmul.f32 %v2506_v31, %v1283_v54  ;;  %1482 = vst [vmem:[#allocation7 + $0xc8] sm:$0xff] %v1418_v61  ;;  %1483 = vst [vmem:[#allocation7 + $0xd0] sm:$0xff] %v1419_v63  ;;  %v1355_v60 = vmul.f32 %v2506_v31, %v1284_v59  ;;  %v1300_v47 = vld [vmem:[#allocation2 + $0x188] sm:$0xff]  ;;  %v1301_v10 = vld [vmem:[#allocation2 + $0x190] sm:$0xff] }
 0x1c1   : > { %1484 = vst [vmem:[#allocation7 + $0xd8] sm:$0xff] %v1420_v58  ;;  %v1424_v12 = vadd.f32 %v2508_v36, %v1353_v55  ;;  %v1356_v9 = vmul.f32 %v2506_v31, %v1285_v40  ;;  %v1357_v14 = vmul.f32 %v2506_v31, %v1286_v34  ;;  %1485 = vst [vmem:[#allocation7 + $0xe0] sm:$0xff] %v1421_v5  ;;  %v1302_v35 = vld [vmem:[#allocation2 + $0x198] sm:$0xff]  ;;  %v1303_v27 = vld [vmem:[#allocation2 + $0x1a0] sm:$0xff] }
 0x1c2   : > { %1486 = vst [vmem:[#allocation7 + $0xe8] sm:$0xff] %v1422_v7  ;;  %1487 = vst [vmem:[#allocation7 + $0xf0] sm:$0xff] %v1423_v51  ;;  %v1425_v11 = vadd.f32 %v2508_v36, %v1354_v1  ;;  %v1358_v17 = vmul.f32 %v2506_v31, %v1287_v0  ;;  %v1359_v2 = vmul.f32 %v2506_v31, %v1288_v3  ;;  %v1304_v53 = vld [vmem:[#allocation2 + $0x1a8] sm:$0xff]  ;;  %v1305_v54 = vld [vmem:[#allocation2 + $0x1b0] sm:$0xff] }
 0x1c3   : > { %v1360_v21 = vmul.f32 %v2506_v31, %v1289_v50  ;;  %1488 = vst [vmem:[#allocation7 + $0xf8] sm:$0xff] %v1424_v12  ;;  %v1426_v24 = vadd.f32 %v2508_v36, %v1355_v60  ;;  %v1427_v26 = vadd.f32 %v2508_v36, %v1356_v9  ;;  %v1428_v28 = vadd.f32 %v2508_v36, %v1357_v14  ;;  %v1306_v59 = vld [vmem:[#allocation2 + $0x1b8] sm:$0xff]  ;;  %v1307_v58 = vld [vmem:[#allocation2 + $0x1c0] sm:$0xff]  ;;  %v1308_v5 = vld [vmem:[#allocation2 + $0x1c8] sm:$0xff] }
 0x1c4   : > { %v1361_v18 = vmul.f32 %v2506_v31, %v1290_v8  ;;  %1489 = vst [vmem:[#allocation7 + $0x100] sm:$0xff] %v1425_v11  ;;  %v1429_v16 = vadd.f32 %v2508_v36, %v1358_v17  ;;  %v1430_v33 = vadd.f32 %v2508_v36, %v1359_v2  ;;  %v1362_v49 = vmul.f32 %v2506_v31, %v1291_v15  ;;  %v1309_v7 = vld [vmem:[#allocation2 + $0x1d0] sm:$0xff]  ;;  %v1310_v51 = vld [vmem:[#allocation2 + $0x1d8] sm:$0xff]  ;;  %v1311_v9 = vld [vmem:[#allocation2 + $0x1e0] sm:$0xff] }
 0x1c5   : > { %v1431_v13 = vadd.f32 %v2508_v36, %v1360_v21  ;;  %1490 = vst [vmem:[#allocation7 + $0x108] sm:$0xff] %v1426_v24  ;;  %1491 = vst [vmem:[#allocation7 + $0x110] sm:$0xff] %v1427_v26  ;;  %v1363_v43 = vmul.f32 %v2506_v31, %v1292_v6  ;;  %v1364_v25 = vmul.f32 %v2506_v31, %v1293_v22  ;;  %v1312_v14 = vld [vmem:[#allocation2 + $0x1e8] sm:$0xff]  ;;  %v1313_v15 = vld [vmem:[#allocation2 + $0x1f0] sm:$0xff] }
 0x1c6   : > { %1492 = vst [vmem:[#allocation7 + $0x118] sm:$0xff] %v1428_v28  ;;  %v1432_v39 = vadd.f32 %v2508_v36, %v1361_v18  ;;  %v1365_v41 = vmul.f32 %v2506_v31, %v1294_v23  ;;  %1493 = vst [vmem:[#allocation7 + $0x120] sm:$0xff] %v1429_v16  ;;  %v1433_v44 = vadd.f32 %v2508_v36, %v1362_v49  ;;  %v1314_v6 = vld [vmem:[#allocation2 + $0x1f8] sm:$0xff] }
 0x1c7   : > { %1494 = vst [vmem:[#allocation7 + $0x128] sm:$0xff] %v1430_v33  ;;  %1495 = vst [vmem:[#allocation7 + $0x130] sm:$0xff] %v1431_v13  ;;  %v1366_v20 = vmul.f32 %v2506_v31, %v1295_v29  ;;  %v1367_v56 = vmul.f32 %v2506_v31, %v1296_v32  ;;  %v1368_v46 = vmul.f32 %v2506_v31, %v1297_v37 }
 0x1c8   : > { %1496 = vst [vmem:[#allocation7 + $0x138] sm:$0xff] %v1432_v39  ;;  %v1434_v48 = vadd.f32 %v2508_v36, %v1363_v43  ;;  %v1435_v4 = vadd.f32 %v2508_v36, %v1364_v25  ;;  %v1436_v52 = vadd.f32 %v2508_v36, %v1365_v41  ;;  %v1369_v30 = vmul.f32 %v2506_v31, %v1298_v38 }
 0x1c9   : > { %1497 = vst [vmem:[#allocation7 + $0x140] sm:$0xff] %v1433_v44  ;;  %v1437_v19 = vadd.f32 %v2508_v36, %v1366_v20  ;;  %v1438_v45 = vadd.f32 %v2508_v36, %v1367_v56  ;;  %v1439_v57 = vadd.f32 %v2508_v36, %v1368_v46  ;;  %v1370_v42 = vmul.f32 %v2506_v31, %v1299_v62 }
 0x1ca   : > { %1498 = vst [vmem:[#allocation7 + $0x148] sm:$0xff] %v1434_v48  ;;  %1499 = vst [vmem:[#allocation7 + $0x150] sm:$0xff] %v1435_v4  ;;  %v1440_v40 = vadd.f32 %v2508_v36, %v1369_v30  ;;  %v1371_v34 = vmul.f32 %v2506_v31, %v1300_v47  ;;  %v1372_v61 = vmul.f32 %v2506_v31, %v1301_v10 }
 0x1cb   : > { %1500 = vst [vmem:[#allocation7 + $0x158] sm:$0xff] %v1436_v52  ;;  %v1373_v63 = vmul.f32 %v2506_v31, %v1302_v35  ;;  %1501 = vst [vmem:[#allocation7 + $0x160] sm:$0xff] %v1437_v19  ;;  %v1441_v55 = vadd.f32 %v2508_v36, %v1370_v42  ;;  %v1374_v0 = vmul.f32 %v2506_v31, %v1303_v27 }
 0x1cc   : > { %1502 = vst [vmem:[#allocation7 + $0x168] sm:$0xff] %v1438_v45  ;;  %1503 = vst [vmem:[#allocation7 + $0x170] sm:$0xff] %v1439_v57  ;;  %v1375_v3 = vmul.f32 %v2506_v31, %v1304_v53  ;;  %v1376_v50 = vmul.f32 %v2506_v31, %v1305_v54  ;;  %v1442_v1 = vadd.f32 %v2508_v36, %v1371_v34 }
 0x1cd   : > { %1504 = vst [vmem:[#allocation7 + $0x178] sm:$0xff] %v1440_v40  ;;  %v1443_v8 = vadd.f32 %v2508_v36, %v1372_v61  ;;  %v1444_v12 = vadd.f32 %v2508_v36, %v1373_v63  ;;  %v1377_v60 = vmul.f32 %v2506_v31, %v1306_v59  ;;  %1505 = vst [vmem:[#allocation7 + $0x180] sm:$0xff] %v1441_v55 }
 0x1ce   : > { %v1445_v11 = vadd.f32 %v2508_v36, %v1374_v0  ;;  %v1446_v17 = vadd.f32 %v2508_v36, %v1375_v3  ;;  %v1447_v2 = vadd.f32 %v2508_v36, %v1376_v50  ;;  %v1378_v21 = vmul.f32 %v2506_v31, %v1307_v58  ;;  %1506 = vst [vmem:[#allocation7 + $0x188] sm:$0xff] %v1442_v1 }
 0x1cf   : > { %1507 = vst [vmem:[#allocation7 + $0x190] sm:$0xff] %v1443_v8  ;;  %1508 = vst [vmem:[#allocation7 + $0x198] sm:$0xff] %v1444_v12  ;;  %v1448_v22 = vadd.f32 %v2508_v36, %v1377_v60  ;;  %v1379_v23 = vmul.f32 %v2506_v31, %v1308_v5  ;;  %v1380_v24 = vmul.f32 %v2506_v31, %v1309_v7 }
 0x1d0   : > { %v1381_v26 = vmul.f32 %v2506_v31, %v1310_v51  ;;  %1509 = vst [vmem:[#allocation7 + $0x1a0] sm:$0xff] %v1445_v11  ;;  %1510 = vst [vmem:[#allocation7 + $0x1a8] sm:$0xff] %v1446_v17  ;;  %v1449_v28 = vadd.f32 %v2508_v36, %v1378_v21  ;;  %v1382_v18 = vmul.f32 %v2506_v31, %v1311_v9 }
 0x1d1   : > { %1511 = vst [vmem:[#allocation7 + $0x1b0] sm:$0xff] %v1447_v2  ;;  %v1383_v29 = vmul.f32 %v2506_v31, %v1312_v14  ;;  %v1384_v32 = vmul.f32 %v2506_v31, %v1313_v15  ;;  %1512 = vst [vmem:[#allocation7 + $0x1b8] sm:$0xff] %v1448_v22  ;;  %v1450_v37 = vadd.f32 %v2508_v36, %v1379_v23 }
 0x1d2   : > { %v1451_v16 = vadd.f32 %v2508_v36, %v1380_v24  ;;  %v1452_v33 = vadd.f32 %v2508_v36, %v1381_v26  ;;  %v1385_v13 = vmul.f32 %v2506_v31, %v1314_v6  ;;  %1513 = vst [vmem:[#allocation7 + $0x1c0] sm:$0xff] %v1449_v28  ;;  %v1453_v49 = vadd.f32 %v2508_v36, %v1382_v18 }
 0x1d3   : > { %v1454_v38 = vadd.f32 %v2508_v36, %v1383_v29  ;;  %v1455_v39 = vadd.f32 %v2508_v36, %v1384_v32  ;;  %1514 = vst [vmem:[#allocation7 + $0x1c8] sm:$0xff] %v1450_v37 }
 0x1d4   : > { %1515 = vst [vmem:[#allocation7 + $0x1d0] sm:$0xff] %v1451_v16  ;;  %1516 = vst [vmem:[#allocation7 + $0x1d8] sm:$0xff] %v1452_v33  ;;  %v1456_v43 = vadd.f32 %v2508_v36, %v1385_v13 }
 0x1d5   : > { %1517 = vst [vmem:[#allocation7 + $0x1e0] sm:$0xff] %v1453_v49  ;;  %1518 = vst [vmem:[#allocation7 + $0x1e8] sm:$0xff] %v1454_v38 }
 0x1d6   : > { %1519 = vst [vmem:[#allocation7 + $0x1f0] sm:$0xff] %v1455_v39  ;;  %1520 = vst [vmem:[#allocation7 + $0x1f8] sm:$0xff] %v1456_v43 }
 0x1d7 PF: > { %p2640_p7 = scmp.eq.s32.totalorder %s1610_s18, 1  ;;  %s1976_s23 = smov [#allocation7]  }
 0x1d8   : > { %s1536_s24 = sshll.u32 %s1976_s23, 4  ;;  %s1537_s24 = int_to_ptr.vmem [resolvable:$true] %s1536_s24 }
 0x1d9   : > { %s1921_s25 = scalar_lea.vmem %s1537_s24, 8192  ;;  %s1927_s26 = scalar_lea.vmem %s1537_s24, 16384 }
 0x1da   : > { %p1922_p8 = scmp.ne.s32.totalorder %s1537_s24, %s1921_s25  ;;  %p1928_p11 = scmp.lt.s32.totalorder %s1537_s24, %s1537_s24 }
 0x1db   : > { %p1929_p12 = scmp.lt.s32.totalorder %s1927_s26, %s1921_s25 }
 0x1dc   : > { %p1923_p9 = pnand %p1922_p8, %p2640_p7 }
 0x1dd   : > { %p1930_p13 = por %p1929_p12, %p1928_p11 }
 0x1de   : > { %p1924_p10 = pneg %p1923_p9 }
 0x1e0   : > { %p1931_p0 = pnand %p1930_p13, %p1924_p10 }
 0x1e2   : > { %1934 = shalt.err (!%p1931_p0)
}
 0x1e3   : > { %s1935_s28 = scalar_lea.hbm %s2678_s4, 8192 }
 0x1e4   : > { %p1936_p1 = scmp.ne.s32.totalorder %s2678_s4, %s1935_s28  ;;  %p1941_p4 = scmp.lt.u32.totalorder %s1935_s28, %s2678_s4 }
 0x1e6   : > { %p1937_p2 = pnand %p1936_p1, %p2640_p7 }
 0x1e8   : > { %p1938_p3 = pneg %p1937_p2 }
 0x1ea   : > { %p1943_p5 = pnand %p1941_p4, %p1938_p3 }
 0x1ec   : > { %1946 = shalt.err (!%p1943_p5)
}
 0x1ed   : > { %s1977_s7 = smov 128   ;;  %s1978_s8 = smov 8  }
 0x1ee   : > { %1881 = dma.vmem_to_hbm [thread:$0]  (%p2640_p7), %s1537_s24, 8192, %s2678_s4, [#allocation8], %s1977_s7, %s1977_s7, %s1978_s8  }
 0x1ef PF: > { %p1889_p6 = scmp.ge.s32.totalorder %s1973_s17, 2  ;;  %p1890_p8 = scmp.eq.s32.totalorder %s1611_s19, 1 }
 0x1f1   : > { %p1885_p9 = pnand %p1890_p8, %p1889_p6 }
 0x1f3   : > { %1960 = dma.done.wait (!%p1885_p9), [#allocation8], 8192  }
 0x1f4   : > { %1962 = vsyncadd (!%p1885_p9), [#allocation8], 4294959104  ;;  %s17_s17 = sadd.s32 1, %s1973_s17   ;;  %s2680_s15 = smov %s1969_s16 }
 0x1f5   : > { %p14_p10 = scmp.ge.s32.totalorder %s17_s17, 4   ;;  %s2681_s16 = smov %s2683_s20 }
 0x1f7   :  { %16 = sbr.rel (!%p14_p10) target bundleno = 3 (0x3), region = 89 }
 0x1fe   :  { %1557 = vsyncpa [#allocation8], 1 }
 0x1ff   :  { %1559 = vsyncpa [#allocation8 + $0x1], 1 }

</bundles_post_ra>
